<compile_context>
chip_gen: v5e
topology: v5e:2x2
jax: 0.10.0
libtpu: 0.0.40
codegen_flags: <defaults>
</compile_context>

<pallas_src>
import jax
import jax.numpy as jnp
from jax.experimental import pallas as pl
from jax.experimental.pallas import tpu as pltpu

EPS = 1e-5

# bf16 patch/weight stream (MXU-native on v5e/v6e/v7x); accumulation and all
# BN math stay f32.  Use jnp.float32 for exact PyTorch parity.
MATMUL_INPUT_DTYPE = jnp.bfloat16

# Keep one conv call's double-buffered working set under ~30 MiB (safe inside
# v7x's 64 MiB physical VMEM) and raise the scoped limit to 40 MiB so large
# tiles also compile on v5e (16 MiB default scoped) / v6e (32 MiB default).
_VMEM_BUDGET = 30 * 1024 * 1024
_VMEM_LIMIT = 40 * 1024 * 1024


# ------------------------------ Pallas kernels -------------------------------

def _matmul_stats_kernel(p_ref, w_ref, y_ref, s_ref, ss_ref):
    """Conv-as-matmul for one M tile with fused per-channel BN statistics.

    p_ref : (K, tm)      im2col patches tile (bf16/f32), lane-dense
    w_ref : (Co, K)      reshaped conv weight
    y_ref : (Co, tm)     pre-BN conv output tile (f32, lane-dense)
    s_ref : (1, Co, 128) lane-partial per-channel sum      (this parallel slice)
    ss_ref: (1, Co, 128) lane-partial per-channel sum(x^2) (this parallel slice)

    Grid is (P, tiles): axis 0 is megacore-parallel (separate partial stats per
    slice), axis 1 is the sequential M sweep the accumulators live across.
    """
    @pl.when(pl.program_id(1) == 0)
    def _():
        s_ref[...] = jnp.zeros_like(s_ref)
        ss_ref[...] = jnp.zeros_like(ss_ref)

    y = jnp.dot(w_ref[...], p_ref[...], preferred_element_type=jnp.float32)
    y_ref[...] = y

    # Lane-partial statistics: VPU adds on lane-aligned 128-wide slices; the
    # final 128-lane reduce happens once in XLA.  Padded M columns are exactly
    # zero (conv bias dropped), so they contribute nothing to the sums.
    tm = y.shape[1]
    c = y[:, 0:128]
    s_part, ss_part = c, c * c
    for j in range(1, tm // 128):
        c = y[:, j * 128:(j + 1) * 128]
        s_part = s_part + c
        ss_part = ss_part + c * c
    s_ref[...] += s_part[None]
    ss_ref[...] += ss_part[None]


def _matmul_bias_tanh_kernel(p_ref, w_ref, b_ref, o_ref):
    """Final 7x7 conv: matmul + bias + tanh fused (no BN follows)."""
    y = jnp.dot(w_ref[...], p_ref[...], preferred_element_type=jnp.float32)
    o_ref[...] = jnp.tanh(y + b_ref[...])


# --------------------------- tiling / pallas wrappers -------------------------

def _tile_plan(K, Co, M):
    """VMEM-aware tile width, 2-way parallel split and padded M."""
    in_b = jnp.dtype(MATMUL_INPUT_DTYPE).itemsize
    tm = 128
    for cand in (2048, 1024, 512, 256, 128):
        est = (2 * K * cand * in_b      # double-buffered patch tile
               + 2 * Co * cand * 4      # double-buffered f32 output tile
               + 2 * K * Co * in_b      # (double-buffered) weight
               + 4 * Co * 128 * 4)      # stats accumulators
        if est <= _VMEM_BUDGET:
            tm = cand
            break
    # Don't over-pad tiny problems: shrink until two tiles cover M.
    m128 = ((M + 127) // 128) * 128
    while tm > 128 and 2 * tm > m128:
        tm //= 2
    p = 2 if m128 >= 2 * tm else 1          # megacore split (helps v7x)
    step = p * tm
    mp = ((M + step - 1) // step) * step    # pad M UP to a tile multiple
    return tm, p, mp


def _pad_cols(a, mp):
    m = a.shape[1]
    return a if m == mp else jnp.pad(a, ((0, 0), (0, mp - m)))


def _conv_matmul_stats(patchesT, w2d):
    """y = w2d @ patchesT with fused per-channel sum / sum-of-squares."""
    K, M = patchesT.shape
    Co = w2d.shape[0]
    tm, P, Mp = _tile_plan(K, Co, M)
    tiles = Mp // (P * tm)
    pT = _pad_cols(patchesT.astype(MATMUL_INPUT_DTYPE), Mp)

    y, s, ss = pl.pallas_call(
        _matmul_stats_kernel,
        out_shape=(jax.ShapeDtypeStruct((Co, Mp), jnp.float32),
                   jax.ShapeDtypeStruct((P, Co, 128), jnp.float32),
                   jax.ShapeDtypeStruct((P, Co, 128), jnp.float32)),
        grid=(P, tiles),
        in_specs=[pl.BlockSpec((K, tm), lambda p, i: (0, p * tiles + i)),
                  pl.BlockSpec((Co, K), lambda p, i: (0, 0))],
        out_specs=[pl.BlockSpec((Co, tm), lambda p, i: (0, p * tiles + i)),
                   pl.BlockSpec((1, Co, 128), lambda p, i: (p, 0, 0)),
                   pl.BlockSpec((1, Co, 128), lambda p, i: (p, 0, 0))],
        compiler_params=pltpu.CompilerParams(
            # Stats accumulate across the M axis -> it must stay sequential;
            # the leading size-P axis is parallel so both v7x cores are used.
            dimension_semantics=("parallel", "arbitrary"),
            vmem_limit_bytes=_VMEM_LIMIT),
    )(pT, w2d.astype(MATMUL_INPUT_DTYPE))
    if Mp != M:
        y = y[:, :M]
    return y, s, ss


def _conv_tanh(patchesT, w2d, bias):
    K, M = patchesT.shape
    Co = w2d.shape[0]
    tm, _, Mp = _tile_plan(K, Co, M)
    pT = _pad_cols(patchesT.astype(MATMUL_INPUT_DTYPE), Mp)
    out = pl.pallas_call(
        _matmul_bias_tanh_kernel,
        out_shape=jax.ShapeDtypeStruct((Co, Mp), jnp.float32),
        grid=(Mp // tm,),
        in_specs=[pl.BlockSpec((K, tm), lambda i: (0, i)),
                  pl.BlockSpec((Co, K), lambda i: (0, 0)),
                  pl.BlockSpec((Co, 1), lambda i: (0, 0))],
        out_specs=pl.BlockSpec((Co, tm), lambda i: (0, i)),
        compiler_params=pltpu.CompilerParams(
            dimension_semantics=("parallel",),   # megacore splits this axis
            vmem_limit_bytes=_VMEM_LIMIT),
    )(pT, w2d.astype(MATMUL_INPUT_DTYPE),
      bias.astype(jnp.float32).reshape(-1, 1))
    return out[:, :M] if Mp != M else out


# ------------------------------- XLA-side glue --------------------------------

def _im2col_T(xp, k):
    """(C, N, Hp, Wp) padded input -> (C*k*k, N*Ho*Wo) transposed patches.

    K index flattened as c*k*k + kh*k + kw, matching weight.reshape(Co, -1).
    The preceding BN scale/shift(+ReLU) elementwise ops fuse into this patch
    materialization, so no standalone BN-apply HBM pass is needed.
    """
    C, N, Hp, Wp = xp.shape
    Ho, Wo = Hp - k + 1, Wp - k + 1
    cols = [xp[:, :, kh:kh + Ho, kw:kw + Wo]
            for kh in range(k) for kw in range(k)]
    p = jnp.stack(cols, axis=1)                        # (C, k*k, N, Ho, Wo)
    return p.reshape(C * k * k, N * Ho * Wo), (N, Ho, Wo)


def _conv3_same(x_cnhw, w4d):
    """3x3, stride 1, pad 1 conv (bias exactly absorbed by training-mode BN)."""
    xp = jnp.pad(x_cnhw, ((0, 0), (0, 0), (1, 1), (1, 1)))
    patchesT, _ = _im2col_T(xp, 3)
    return _conv_matmul_stats(patchesT, w4d.reshape(w4d.shape[0], -1))


def _convT_subpixel_weight(w):
    """ConvTranspose2d(k=3, s=2, p=1, out_pad=1) as 4 stacked sub-pixel phases.

    Each output phase (oy%2, ox%2) of the 2x-upsampled result is an ordinary
    3x3 same-pad conv of the ORIGINAL-resolution input with a sub-filter of the
    transposed kernel; stacking the 4 phases gives one (4*Co, 9*Ci) weight so a
    single matmul over the plain 3x3 im2col patches produces all phases.
    (From oy = 2*iy - 1 + ky: even rows use ky=1; odd rows use ky in {0, 2}.)
    """
    wt = jnp.transpose(w, (1, 0, 2, 3))                # (Co, Ci, 3, 3)
    co, ci = wt.shape[0], wt.shape[1]
    g = jnp.zeros((4, co, ci, 3, 3), wt.dtype)
    g = g.at[0, :, :, 1, 1].set(wt[:, :, 1, 1])        # phase (even, even)
    g = g.at[1, :, :, 1, 1].set(wt[:, :, 1, 2])        # phase (even, odd)
    g = g.at[1, :, :, 1, 2].set(wt[:, :, 1, 0])
    g = g.at[2, :, :, 1, 1].set(wt[:, :, 2, 1])        # phase (odd, even)
    g = g.at[2, :, :, 2, 1].set(wt[:, :, 0, 1])
    g = g.at[3, :, :, 1, 1].set(wt[:, :, 2, 2])        # phase (odd, odd)
    g = g.at[3, :, :, 1, 2].set(wt[:, :, 2, 0])
    g = g.at[3, :, :, 2, 1].set(wt[:, :, 0, 2])
    g = g.at[3, :, :, 2, 2].set(wt[:, :, 0, 0])
    return g.reshape(4 * co, ci * 9)


def _interleave_phases(y4, co, n, h, w):
    """(4*Co, N*H*W) phase-stacked output -> (Co, N, 2H, 2W)."""
    t = y4.reshape(2, 2, co, n, h, w)                  # (ry, rx, Co, N, H, W)
    t = jnp.transpose(t, (2, 3, 4, 0, 5, 1))           # (Co, N, H, ry, W, rx)
    return t.reshape(co, n, 2 * h, 2 * w)


def _bn_affine(s, ss, count, gamma, beta, phases=1):
    """Training-mode BatchNorm2d scale/shift from fused partial statistics."""
    s_tot = s.sum(axis=(0, 2))                         # parallel slices + lanes
    ss_tot = ss.sum(axis=(0, 2))
    if phases > 1:                                     # combine sub-pixel phases
        s_tot = s_tot.reshape(phases, -1).sum(axis=0)
        ss_tot = ss_tot.reshape(phases, -1).sum(axis=0)
    mean = s_tot / count
    # TODO(synk): single-pass E[x^2]-mean^2 can cancel when |mean| >> std; a
    # shifted/two-pass formulation would track PyTorch's accumulation closer.
    var = jnp.maximum(ss_tot / count - mean * mean, 0.0)   # biased (training BN)
    inv_std = jax.lax.rsqrt(var + EPS)
    scale = gamma * inv_std
    shift = beta - mean * scale
    return scale, shift


def resnet_decoder_forward(x_nchw, params):
    h = jnp.transpose(x_nchw.astype(jnp.float32), (1, 0, 2, 3))  # NCHW -> CNHW

    for (w1, g1, b1, w2, g2, b2) in params["blocks"]:
        c, n, hh, ww = h.shape
        skip = h
        y1, s1, ss1 = _conv3_same(h, w1)                         # conv1 + stats
        sc, sh = _bn_affine(s1, ss1, n * hh * ww, g1, b1)
        # BN + ReLU: elementwise, fused by XLA into conv2's patch build.
        h1 = jnp.maximum(y1 * sc[:, None] + sh[:, None],
                         0.0).reshape(c, n, hh, ww)
        y2, s2, ss2 = _conv3_same(h1, w2)                        # conv2 + stats
        sc, sh = _bn_affine(s2, ss2, n * hh * ww, g2, b2)
        # BN + residual add: materialized (block output is consumed twice).
        h = (y2 * sc[:, None] + sh[:, None]).reshape(c, n, hh, ww) + skip

    for (wt, g, b) in params["ups"]:
        c, n, hh, ww = h.shape
        co = c // 2
        xp = jnp.pad(h, ((0, 0), (0, 0), (1, 1), (1, 1)))
        patchesT, _ = _im2col_T(xp, 3)                 # original resolution
        y, s, ss = _conv_matmul_stats(patchesT, _convT_subpixel_weight(wt))
        sc, sh = _bn_affine(s, ss, 4 * n * hh * ww, g, b, phases=4)
        sc4 = jnp.tile(sc, 4)[:, None]                 # per phase-stacked row
        sh4 = jnp.tile(sh, 4)[:, None]
        hb = jnp.maximum(y * sc4 + sh4, 0.0)           # BN + ReLU (XLA-fused)
        h = _interleave_phases(hb, co, n, hh, ww)      # (Co, N, 2H, 2W)

    wf, bf = params["final"]
    xp = jnp.pad(h, ((0, 0), (0, 0), (3, 3), (3, 3)), mode="reflect")
    patchesT, (n, ho, wo) = _im2col_T(xp, 7)
    out = _conv_tanh(patchesT, wf.reshape(wf.shape[0], -1), bf)
    out = out.reshape(wf.shape[0], n, ho, wo)
    return jnp.transpose(out, (1, 0, 2, 3))            # CNHW -> NCHW


def init_params(key, input_nc, output_nc=3, n_blocks=2, upsample=2):
    """Deterministic init mirroring nn.Conv2d / ConvTranspose2d / BN shapes."""
    def uconv(k, shape, fan_in):
        bound = 1.0 / jnp.sqrt(float(fan_in))
        return jax.random.uniform(k, shape, jnp.float32, -bound, bound)

    params = {"blocks": [], "ups": [], "final": None}
    nc = input_nc
    for _ in range(n_blocks):
        key, k1, k2 = jax.random.split(key, 3)
        w1 = uconv(k1, (nc, nc, 3, 3), nc * 9)
        w2 = uconv(k2, (nc, nc, 3, 3), nc * 9)
        params["blocks"].append((w1, jnp.ones((nc,), jnp.float32),
                                 jnp.zeros((nc,), jnp.float32),
                                 w2, jnp.ones((nc,), jnp.float32),
                                 jnp.zeros((nc,), jnp.float32)))
    for _ in range(upsample):
        key, k1 = jax.random.split(key)
        co = nc // 2
        wt = uconv(k1, (nc, co, 3, 3), co * 9)   # ConvTranspose2d weight layout
        params["ups"].append((wt, jnp.ones((co,), jnp.float32),
                              jnp.zeros((co,), jnp.float32)))
        nc = co
    key, k1, k2 = jax.random.split(key, 3)
    wf = uconv(k1, (output_nc, nc, 7, 7), nc * 49)
    bf = uconv(k2, (output_nc,), nc * 49)
    params["final"] = (wf, bf)
    return params


if __name__ == "__main__":
    key = jax.random.PRNGKey(0)
    kx, kp = jax.random.split(key)

    N, input_nc, H, W = 2, 8, 16, 16
    x = jax.random.normal(kx, (N, input_nc, H, W), jnp.float32)
    params = init_params(kp, input_nc, output_nc=3, n_blocks=2, upsample=2)

    fwd = jax.jit(resnet_decoder_forward)
    out = jax.block_until_ready(fwd(x, params))

    assert out.shape == (N, 3, 4 * H, 4 * W), out.shape
    assert bool(jnp.all(jnp.isfinite(out)))
    assert bool(jnp.all(jnp.abs(out) <= 1.0))   # tanh output range
    print("KERNEL_OK")
</pallas_src>

<mosaic_0001>
module attributes {stable_mosaic.version = 11 : i64} {
  func.func @_matmul_stats_kernel(%arg0: i32, %arg1: i32, %arg2: memref<72x256xbf16, #tpu.memory_space<vmem>>, %arg3: memref<8x72xbf16, #tpu.memory_space<vmem>>, %arg4: memref<8x256xf32, #tpu.memory_space<vmem>>, %arg5: memref<1x8x128xf32, #tpu.memory_space<vmem>>, %arg6: memref<1x8x128xf32, #tpu.memory_space<vmem>>) attributes {dimension_semantics = [#tpu.dimension_semantics<parallel>, #tpu.dimension_semantics<arbitrary>], iteration_bounds = array<i64: 2, 1>, scalar_prefetch = 0 : i64, scratch_operands = 0 : i64, tpu.core_type = #tpu.core_type<tc>, window_params = [{transform_indices = @transform_0, window_bounds = array<i64: 72, 256>}, {pipeline_mode = #tpu.pipeline_mode<synchronous>, transform_indices = @transform_1, window_bounds = array<i64: 8, 72>}, {transform_indices = @transform_2, window_bounds = array<i64: 8, 256>}, {transform_indices = @transform_3, window_bounds = array<i64: 1, 8, 128>}, {transform_indices = @transform_4, window_bounds = array<i64: 1, 8, 128>}]} {
    %c0_i32 = arith.constant 0 : i32
    %0 = arith.cmpi eq, %arg1, %c0_i32 : i32
    %1 = arith.extui %0 : i1 to i32
    %c0_i32_0 = arith.constant 0 : i32
    %2 = arith.cmpi ne, %1, %c0_i32_0 : i32
    scf.if %2 {
      %cst_18 = arith.constant 0.000000e+00 : f32
      %21 = vector.broadcast %cst_18 : f32 to vector<1x8x128xf32>
      %c0_19 = arith.constant 0 : index
      %c0_20 = arith.constant 0 : index
      %c0_21 = arith.constant 0 : index
      %22 = vector.load %arg5[%c0_19, %c0_20, %c0_21] : memref<1x8x128xf32, #tpu.memory_space<vmem>>, vector<1x8x128xf32>
      tpu.vector_store %arg5[%c0_19, %c0_20, %c0_21], %21 {strides = array<i32>} : memref<1x8x128xf32, #tpu.memory_space<vmem>>, vector<1x8x128xf32>,
      %cst_22 = arith.constant 0.000000e+00 : f32
      %23 = vector.broadcast %cst_22 : f32 to vector<1x8x128xf32>
      %c0_23 = arith.constant 0 : index
      %c0_24 = arith.constant 0 : index
      %c0_25 = arith.constant 0 : index
      %24 = vector.load %arg6[%c0_23, %c0_24, %c0_25] : memref<1x8x128xf32, #tpu.memory_space<vmem>>, vector<1x8x128xf32>
      tpu.vector_store %arg6[%c0_23, %c0_24, %c0_25], %23 {strides = array<i32>} : memref<1x8x128xf32, #tpu.memory_space<vmem>>, vector<1x8x128xf32>,
    } else {
    }
    %c0 = arith.constant 0 : index
    %c0_1 = arith.constant 0 : index
    %3 = vector.load %arg3[%c0, %c0_1] : memref<8x72xbf16, #tpu.memory_space<vmem>>, vector<8x72xbf16>
    %c0_2 = arith.constant 0 : index
    %c0_3 = arith.constant 0 : index
    %4 = vector.load %arg2[%c0_2, %c0_3] : memref<72x256xbf16, #tpu.memory_space<vmem>>, vector<72x256xbf16>
    %cst = arith.constant dense<0.000000e+00> : vector<8x256xf32>
    %5 = tpu.matmul %3, %4, %cst {dimension_numbers = #tpu.dot_dimension_numbers<[1], [0], [0], [1], [0, 0, 1, 1], [], []>} : vector<8x72xbf16>, vector<72x256xbf16>, vector<8x256xf32> -> vector<8x256xf32>
    %c0_4 = arith.constant 0 : index
    %c0_5 = arith.constant 0 : index
    %6 = vector.load %arg4[%c0_4, %c0_5] : memref<8x256xf32, #tpu.memory_space<vmem>>, vector<8x256xf32>
    tpu.vector_store %arg4[%c0_4, %c0_5], %5 {strides = array<i32>} : memref<8x256xf32, #tpu.memory_space<vmem>>, vector<8x256xf32>,
    %7 = vector.extract_strided_slice %5 {offsets = [0, 0], sizes = [8, 128], strides = [1, 1]} : vector<8x256xf32> to vector<8x128xf32>
    %8 = arith.mulf %7, %7 : vector<8x128xf32>
    %9 = vector.extract_strided_slice %5 {offsets = [0, 128], sizes = [8, 128], strides = [1, 1]} : vector<8x256xf32> to vector<8x128xf32>
    %10 = arith.addf %7, %9 : vector<8x128xf32>
    %11 = arith.mulf %9, %9 : vector<8x128xf32>
    %12 = arith.addf %8, %11 : vector<8x128xf32>
    %c0_6 = arith.constant 0 : index
    %c0_7 = arith.constant 0 : index
    %c0_8 = arith.constant 0 : index
    %13 = vector.load %arg5[%c0_6, %c0_7, %c0_8] : memref<1x8x128xf32, #tpu.memory_space<vmem>>, vector<1x8x128xf32>
    %14 = vector.shape_cast %10 : vector<8x128xf32> to vector<1x8x128xf32>
    %15 = arith.addf %13, %14 : vector<1x8x128xf32>
    %c0_9 = arith.constant 0 : index
    %c0_10 = arith.constant 0 : index
    %c0_11 = arith.constant 0 : index
    %16 = vector.load %arg5[%c0_9, %c0_10, %c0_11] : memref<1x8x128xf32, #tpu.memory_space<vmem>>, vector<1x8x128xf32>
    tpu.vector_store %arg5[%c0_9, %c0_10, %c0_11], %15 {strides = array<i32>} : memref<1x8x128xf32, #tpu.memory_space<vmem>>, vector<1x8x128xf32>,
    %c0_12 = arith.constant 0 : index
    %c0_13 = arith.constant 0 : index
    %c0_14 = arith.constant 0 : index
    %17 = vector.load %arg6[%c0_12, %c0_13, %c0_14] : memref<1x8x128xf32, #tpu.memory_space<vmem>>, vector<1x8x128xf32>
    %18 = vector.shape_cast %12 : vector<8x128xf32> to vector<1x8x128xf32>
    %19 = arith.addf %17, %18 : vector<1x8x128xf32>
    %c0_15 = arith.constant 0 : index
    %c0_16 = arith.constant 0 : index
    %c0_17 = arith.constant 0 : index
    %20 = vector.load %arg6[%c0_15, %c0_16, %c0_17] : memref<1x8x128xf32, #tpu.memory_space<vmem>>, vector<1x8x128xf32>
    tpu.vector_store %arg6[%c0_15, %c0_16, %c0_17], %19 {strides = array<i32>} : memref<1x8x128xf32, #tpu.memory_space<vmem>>, vector<1x8x128xf32>,
    return
  }
  func.func @transform_0(%arg0: i32, %arg1: i32) -> (i32, i32) {
    %c1_i32 = arith.constant 1 : i32
    %0 = arith.muli %arg0, %c1_i32 : i32
    %1 = arith.addi %0, %arg1 : i32
    %c0_i32 = arith.constant 0 : i32
    %c0_i32_0 = arith.constant 0 : i32
    return %c0_i32, %1 : i32, i32
  }
  func.func @transform_1(%arg0: i32, %arg1: i32) -> (i32, i32) {
    %c0_i32 = arith.constant 0 : i32
    %c0_i32_0 = arith.constant 0 : i32
    %c0_i32_1 = arith.constant 0 : i32
    return %c0_i32, %c0_i32_0 : i32, i32
  }
  func.func @transform_2(%arg0: i32, %arg1: i32) -> (i32, i32) {
    %c1_i32 = arith.constant 1 : i32
    %0 = arith.muli %arg0, %c1_i32 : i32
    %1 = arith.addi %0, %arg1 : i32
    %c0_i32 = arith.constant 0 : i32
    %c0_i32_0 = arith.constant 0 : i32
    return %c0_i32, %1 : i32, i32
  }
  func.func @transform_3(%arg0: i32, %arg1: i32) -> (i32, i32, i32) {
    %c0_i32 = arith.constant 0 : i32
    %c0_i32_0 = arith.constant 0 : i32
    %c0_i32_1 = arith.constant 0 : i32
    return %arg0, %c0_i32, %c0_i32_0 : i32, i32, i32
  }
  func.func @transform_4(%arg0: i32, %arg1: i32) -> (i32, i32, i32) {
    %c0_i32 = arith.constant 0 : i32
    %c0_i32_0 = arith.constant 0 : i32
    %c0_i32_1 = arith.constant 0 : i32
    return %arg0, %c0_i32, %c0_i32_0 : i32, i32, i32
  }
}

module attributes {stable_mosaic.version = 11 : i64} {
  func.func @_matmul_stats_kernel(%arg0: i32, %arg1: i32, %arg2: memref<72x256xbf16, #tpu.memory_space<vmem>>, %arg3: memref<16x72xbf16, #tpu.memory_space<vmem>>, %arg4: memref<16x256xf32, #tpu.memory_space<vmem>>, %arg5: memref<1x16x128xf32, #tpu.memory_space<vmem>>, %arg6: memref<1x16x128xf32, #tpu.memory_space<vmem>>) attributes {dimension_semantics = [#tpu.dimension_semantics<parallel>, #tpu.dimension_semantics<arbitrary>], iteration_bounds = array<i64: 2, 1>, scalar_prefetch = 0 : i64, scratch_operands = 0 : i64, tpu.core_type = #tpu.core_type<tc>, window_params = [{transform_indices = @transform_0, window_bounds = array<i64: 72, 256>}, {pipeline_mode = #tpu.pipeline_mode<synchronous>, transform_indices = @transform_1, window_bounds = array<i64: 16, 72>}, {transform_indices = @transform_2, window_bounds = array<i64: 16, 256>}, {transform_indices = @transform_3, window_bounds = array<i64: 1, 16, 128>}, {transform_indices = @transform_4, window_bounds = array<i64: 1, 16, 128>}]} {
    %c0_i32 = arith.constant 0 : i32
    %0 = arith.cmpi eq, %arg1, %c0_i32 : i32
    %1 = arith.extui %0 : i1 to i32
    %c0_i32_0 = arith.constant 0 : i32
    %2 = arith.cmpi ne, %1, %c0_i32_0 : i32
    scf.if %2 {
      %cst_18 = arith.constant 0.000000e+00 : f32
      %21 = vector.broadcast %cst_18 : f32 to vector<1x16x128xf32>
      %c0_19 = arith.constant 0 : index
      %c0_20 = arith.constant 0 : index
      %c0_21 = arith.constant 0 : index
      %22 = vector.load %arg5[%c0_19, %c0_20, %c0_21] : memref<1x16x128xf32, #tpu.memory_space<vmem>>, vector<1x16x128xf32>
      tpu.vector_store %arg5[%c0_19, %c0_20, %c0_21], %21 {strides = array<i32>} : memref<1x16x128xf32, #tpu.memory_space<vmem>>, vector<1x16x128xf32>,
      %cst_22 = arith.constant 0.000000e+00 : f32
      %23 = vector.broadcast %cst_22 : f32 to vector<1x16x128xf32>
      %c0_23 = arith.constant 0 : index
      %c0_24 = arith.constant 0 : index
      %c0_25 = arith.constant 0 : index
      %24 = vector.load %arg6[%c0_23, %c0_24, %c0_25] : memref<1x16x128xf32, #tpu.memory_space<vmem>>, vector<1x16x128xf32>
      tpu.vector_store %arg6[%c0_23, %c0_24, %c0_25], %23 {strides = array<i32>} : memref<1x16x128xf32, #tpu.memory_space<vmem>>, vector<1x16x128xf32>,
    } else {
    }
    %c0 = arith.constant 0 : index
    %c0_1 = arith.constant 0 : index
    %3 = vector.load %arg3[%c0, %c0_1] : memref<16x72xbf16, #tpu.memory_space<vmem>>, vector<16x72xbf16>
    %c0_2 = arith.constant 0 : index
    %c0_3 = arith.constant 0 : index
    %4 = vector.load %arg2[%c0_2, %c0_3] : memref<72x256xbf16, #tpu.memory_space<vmem>>, vector<72x256xbf16>
    %cst = arith.constant dense<0.000000e+00> : vector<16x256xf32>
    %5 = tpu.matmul %3, %4, %cst {dimension_numbers = #tpu.dot_dimension_numbers<[1], [0], [0], [1], [0, 0, 1, 1], [], []>} : vector<16x72xbf16>, vector<72x256xbf16>, vector<16x256xf32> -> vector<16x256xf32>
    %c0_4 = arith.constant 0 : index
    %c0_5 = arith.constant 0 : index
    %6 = vector.load %arg4[%c0_4, %c0_5] : memref<16x256xf32, #tpu.memory_space<vmem>>, vector<16x256xf32>
    tpu.vector_store %arg4[%c0_4, %c0_5], %5 {strides = array<i32>} : memref<16x256xf32, #tpu.memory_space<vmem>>, vector<16x256xf32>,
    %7 = vector.extract_strided_slice %5 {offsets = [0, 0], sizes = [16, 128], strides = [1, 1]} : vector<16x256xf32> to vector<16x128xf32>
    %8 = arith.mulf %7, %7 : vector<16x128xf32>
    %9 = vector.extract_strided_slice %5 {offsets = [0, 128], sizes = [16, 128], strides = [1, 1]} : vector<16x256xf32> to vector<16x128xf32>
    %10 = arith.addf %7, %9 : vector<16x128xf32>
    %11 = arith.mulf %9, %9 : vector<16x128xf32>
    %12 = arith.addf %8, %11 : vector<16x128xf32>
    %c0_6 = arith.constant 0 : index
    %c0_7 = arith.constant 0 : index
    %c0_8 = arith.constant 0 : index
    %13 = vector.load %arg5[%c0_6, %c0_7, %c0_8] : memref<1x16x128xf32, #tpu.memory_space<vmem>>, vector<1x16x128xf32>
    %14 = vector.shape_cast %10 : vector<16x128xf32> to vector<1x16x128xf32>
    %15 = arith.addf %13, %14 : vector<1x16x128xf32>
    %c0_9 = arith.constant 0 : index
    %c0_10 = arith.constant 0 : index
    %c0_11 = arith.constant 0 : index
    %16 = vector.load %arg5[%c0_9, %c0_10, %c0_11] : memref<1x16x128xf32, #tpu.memory_space<vmem>>, vector<1x16x128xf32>
    tpu.vector_store %arg5[%c0_9, %c0_10, %c0_11], %15 {strides = array<i32>} : memref<1x16x128xf32, #tpu.memory_space<vmem>>, vector<1x16x128xf32>,
    %c0_12 = arith.constant 0 : index
    %c0_13 = arith.constant 0 : index
    %c0_14 = arith.constant 0 : index
    %17 = vector.load %arg6[%c0_12, %c0_13, %c0_14] : memref<1x16x128xf32, #tpu.memory_space<vmem>>, vector<1x16x128xf32>
    %18 = vector.shape_cast %12 : vector<16x128xf32> to vector<1x16x128xf32>
    %19 = arith.addf %17, %18 : vector<1x16x128xf32>
    %c0_15 = arith.constant 0 : index
    %c0_16 = arith.constant 0 : index
    %c0_17 = arith.constant 0 : index
    %20 = vector.load %arg6[%c0_15, %c0_16, %c0_17] : memref<1x16x128xf32, #tpu.memory_space<vmem>>, vector<1x16x128xf32>
    tpu.vector_store %arg6[%c0_15, %c0_16, %c0_17], %19 {strides = array<i32>} : memref<1x16x128xf32, #tpu.memory_space<vmem>>, vector<1x16x128xf32>,
    return
  }
  func.func @transform_0(%arg0: i32, %arg1: i32) -> (i32, i32) {
    %c1_i32 = arith.constant 1 : i32
    %0 = arith.muli %arg0, %c1_i32 : i32
    %1 = arith.addi %0, %arg1 : i32
    %c0_i32 = arith.constant 0 : i32
    %c0_i32_0 = arith.constant 0 : i32
    return %c0_i32, %1 : i32, i32
  }
  func.func @transform_1(%arg0: i32, %arg1: i32) -> (i32, i32) {
    %c0_i32 = arith.constant 0 : i32
    %c0_i32_0 = arith.constant 0 : i32
    %c0_i32_1 = arith.constant 0 : i32
    return %c0_i32, %c0_i32_0 : i32, i32
  }
  func.func @transform_2(%arg0: i32, %arg1: i32) -> (i32, i32) {
    %c1_i32 = arith.constant 1 : i32
    %0 = arith.muli %arg0, %c1_i32 : i32
    %1 = arith.addi %0, %arg1 : i32
    %c0_i32 = arith.constant 0 : i32
    %c0_i32_0 = arith.constant 0 : i32
    return %c0_i32, %1 : i32, i32
  }
  func.func @transform_3(%arg0: i32, %arg1: i32) -> (i32, i32, i32) {
    %c0_i32 = arith.constant 0 : i32
    %c0_i32_0 = arith.constant 0 : i32
    %c0_i32_1 = arith.constant 0 : i32
    return %arg0, %c0_i32, %c0_i32_0 : i32, i32, i32
  }
  func.func @transform_4(%arg0: i32, %arg1: i32) -> (i32, i32, i32) {
    %c0_i32 = arith.constant 0 : i32
    %c0_i32_0 = arith.constant 0 : i32
    %c0_i32_1 = arith.constant 0 : i32
    return %arg0, %c0_i32, %c0_i32_0 : i32, i32, i32
  }
}

module attributes {stable_mosaic.version = 11 : i64} {
  func.func @_matmul_stats_kernel(%arg0: i32, %arg1: i32, %arg2: memref<36x1024xbf16, #tpu.memory_space<vmem>>, %arg3: memref<8x36xbf16, #tpu.memory_space<vmem>>, %arg4: memref<8x1024xf32, #tpu.memory_space<vmem>>, %arg5: memref<1x8x128xf32, #tpu.memory_space<vmem>>, %arg6: memref<1x8x128xf32, #tpu.memory_space<vmem>>) attributes {dimension_semantics = [#tpu.dimension_semantics<parallel>, #tpu.dimension_semantics<arbitrary>], iteration_bounds = array<i64: 2, 1>, scalar_prefetch = 0 : i64, scratch_operands = 0 : i64, tpu.core_type = #tpu.core_type<tc>, window_params = [{transform_indices = @transform_0, window_bounds = array<i64: 36, 1024>}, {pipeline_mode = #tpu.pipeline_mode<synchronous>, transform_indices = @transform_1, window_bounds = array<i64: 8, 36>}, {transform_indices = @transform_2, window_bounds = array<i64: 8, 1024>}, {transform_indices = @transform_3, window_bounds = array<i64: 1, 8, 128>}, {transform_indices = @transform_4, window_bounds = array<i64: 1, 8, 128>}]} {
    %c0_i32 = arith.constant 0 : i32
    %0 = arith.cmpi eq, %arg1, %c0_i32 : i32
    %1 = arith.extui %0 : i1 to i32
    %c0_i32_0 = arith.constant 0 : i32
    %2 = arith.cmpi ne, %1, %c0_i32_0 : i32
    scf.if %2 {
      %cst_18 = arith.constant 0.000000e+00 : f32
      %45 = vector.broadcast %cst_18 : f32 to vector<1x8x128xf32>
      %c0_19 = arith.constant 0 : index
      %c0_20 = arith.constant 0 : index
      %c0_21 = arith.constant 0 : index
      %46 = vector.load %arg5[%c0_19, %c0_20, %c0_21] : memref<1x8x128xf32, #tpu.memory_space<vmem>>, vector<1x8x128xf32>
      tpu.vector_store %arg5[%c0_19, %c0_20, %c0_21], %45 {strides = array<i32>} : memref<1x8x128xf32, #tpu.memory_space<vmem>>, vector<1x8x128xf32>,
      %cst_22 = arith.constant 0.000000e+00 : f32
      %47 = vector.broadcast %cst_22 : f32 to vector<1x8x128xf32>
      %c0_23 = arith.constant 0 : index
      %c0_24 = arith.constant 0 : index
      %c0_25 = arith.constant 0 : index
      %48 = vector.load %arg6[%c0_23, %c0_24, %c0_25] : memref<1x8x128xf32, #tpu.memory_space<vmem>>, vector<1x8x128xf32>
      tpu.vector_store %arg6[%c0_23, %c0_24, %c0_25], %47 {strides = array<i32>} : memref<1x8x128xf32, #tpu.memory_space<vmem>>, vector<1x8x128xf32>,
    } else {
    }
    %c0 = arith.constant 0 : index
    %c0_1 = arith.constant 0 : index
    %3 = vector.load %arg3[%c0, %c0_1] : memref<8x36xbf16, #tpu.memory_space<vmem>>, vector<8x36xbf16>
    %c0_2 = arith.constant 0 : index
    %c0_3 = arith.constant 0 : index
    %4 = vector.load %arg2[%c0_2, %c0_3] : memref<36x1024xbf16, #tpu.memory_space<vmem>>, vector<36x1024xbf16>
    %cst = arith.constant dense<0.000000e+00> : vector<8x1024xf32>
    %5 = tpu.matmul %3, %4, %cst {dimension_numbers = #tpu.dot_dimension_numbers<[1], [0], [0], [1], [0, 0, 1, 1], [], []>} : vector<8x36xbf16>, vector<36x1024xbf16>, vector<8x1024xf32> -> vector<8x1024xf32>
    %c0_4 = arith.constant 0 : index
    %c0_5 = arith.constant 0 : index
    %6 = vector.load %arg4[%c0_4, %c0_5] : memref<8x1024xf32, #tpu.memory_space<vmem>>, vector<8x1024xf32>
    tpu.vector_store %arg4[%c0_4, %c0_5], %5 {strides = array<i32>} : memref<8x1024xf32, #tpu.memory_space<vmem>>, vector<8x1024xf32>,
    %7 = vector.extract_strided_slice %5 {offsets = [0, 0], sizes = [8, 128], strides = [1, 1]} : vector<8x1024xf32> to vector<8x128xf32>
    %8 = arith.mulf %7, %7 : vector<8x128xf32>
    %9 = vector.extract_strided_slice %5 {offsets = [0, 128], sizes = [8, 128], strides = [1, 1]} : vector<8x1024xf32> to vector<8x128xf32>
    %10 = arith.addf %7, %9 : vector<8x128xf32>
    %11 = arith.mulf %9, %9 : vector<8x128xf32>
    %12 = arith.addf %8, %11 : vector<8x128xf32>
    %13 = vector.extract_strided_slice %5 {offsets = [0, 256], sizes = [8, 128], strides = [1, 1]} : vector<8x1024xf32> to vector<8x128xf32>
    %14 = arith.addf %10, %13 : vector<8x128xf32>
    %15 = arith.mulf %13, %13 : vector<8x128xf32>
    %16 = arith.addf %12, %15 : vector<8x128xf32>
    %17 = vector.extract_strided_slice %5 {offsets = [0, 384], sizes = [8, 128], strides = [1, 1]} : vector<8x1024xf32> to vector<8x128xf32>
    %18 = arith.addf %14, %17 : vector<8x128xf32>
    %19 = arith.mulf %17, %17 : vector<8x128xf32>
    %20 = arith.addf %16, %19 : vector<8x128xf32>
    %21 = vector.extract_strided_slice %5 {offsets = [0, 512], sizes = [8, 128], strides = [1, 1]} : vector<8x1024xf32> to vector<8x128xf32>
    %22 = arith.addf %18, %21 : vector<8x128xf32>
    %23 = arith.mulf %21, %21 : vector<8x128xf32>
    %24 = arith.addf %20, %23 : vector<8x128xf32>
    %25 = vector.extract_strided_slice %5 {offsets = [0, 640], sizes = [8, 128], strides = [1, 1]} : vector<8x1024xf32> to vector<8x128xf32>
    %26 = arith.addf %22, %25 : vector<8x128xf32>
    %27 = arith.mulf %25, %25 : vector<8x128xf32>
    %28 = arith.addf %24, %27 : vector<8x128xf32>
    %29 = vector.extract_strided_slice %5 {offsets = [0, 768], sizes = [8, 128], strides = [1, 1]} : vector<8x1024xf32> to vector<8x128xf32>
    %30 = arith.addf %26, %29 : vector<8x128xf32>
    %31 = arith.mulf %29, %29 : vector<8x128xf32>
    %32 = arith.addf %28, %31 : vector<8x128xf32>
    %33 = vector.extract_strided_slice %5 {offsets = [0, 896], sizes = [8, 128], strides = [1, 1]} : vector<8x1024xf32> to vector<8x128xf32>
    %34 = arith.addf %30, %33 : vector<8x128xf32>
    %35 = arith.mulf %33, %33 : vector<8x128xf32>
    %36 = arith.addf %32, %35 : vector<8x128xf32>
    %c0_6 = arith.constant 0 : index
    %c0_7 = arith.constant 0 : index
    %c0_8 = arith.constant 0 : index
    %37 = vector.load %arg5[%c0_6, %c0_7, %c0_8] : memref<1x8x128xf32, #tpu.memory_space<vmem>>, vector<1x8x128xf32>
    %38 = vector.shape_cast %34 : vector<8x128xf32> to vector<1x8x128xf32>
    %39 = arith.addf %37, %38 : vector<1x8x128xf32>
    %c0_9 = arith.constant 0 : index
    %c0_10 = arith.constant 0 : index
    %c0_11 = arith.constant 0 : index
    %40 = vector.load %arg5[%c0_9, %c0_10, %c0_11] : memref<1x8x128xf32, #tpu.memory_space<vmem>>, vector<1x8x128xf32>
    tpu.vector_store %arg5[%c0_9, %c0_10, %c0_11], %39 {strides = array<i32>} : memref<1x8x128xf32, #tpu.memory_space<vmem>>, vector<1x8x128xf32>,
    %c0_12 = arith.constant 0 : index
    %c0_13 = arith.constant 0 : index
    %c0_14 = arith.constant 0 : index
    %41 = vector.load %arg6[%c0_12, %c0_13, %c0_14] : memref<1x8x128xf32, #tpu.memory_space<vmem>>, vector<1x8x128xf32>
    %42 = vector.shape_cast %36 : vector<8x128xf32> to vector<1x8x128xf32>
    %43 = arith.addf %41, %42 : vector<1x8x128xf32>
    %c0_15 = arith.constant 0 : index
    %c0_16 = arith.constant 0 : index
    %c0_17 = arith.constant 0 : index
    %44 = vector.load %arg6[%c0_15, %c0_16, %c0_17] : memref<1x8x128xf32, #tpu.memory_space<vmem>>, vector<1x8x128xf32>
    tpu.vector_store %arg6[%c0_15, %c0_16, %c0_17], %43 {strides = array<i32>} : memref<1x8x128xf32, #tpu.memory_space<vmem>>, vector<1x8x128xf32>,
    return
  }
  func.func @transform_0(%arg0: i32, %arg1: i32) -> (i32, i32) {
    %c1_i32 = arith.constant 1 : i32
    %0 = arith.muli %arg0, %c1_i32 : i32
    %1 = arith.addi %0, %arg1 : i32
    %c0_i32 = arith.constant 0 : i32
    %c0_i32_0 = arith.constant 0 : i32
    return %c0_i32, %1 : i32, i32
  }
  func.func @transform_1(%arg0: i32, %arg1: i32) -> (i32, i32) {
    %c0_i32 = arith.constant 0 : i32
    %c0_i32_0 = arith.constant 0 : i32
    %c0_i32_1 = arith.constant 0 : i32
    return %c0_i32, %c0_i32_0 : i32, i32
  }
  func.func @transform_2(%arg0: i32, %arg1: i32) -> (i32, i32) {
    %c1_i32 = arith.constant 1 : i32
    %0 = arith.muli %arg0, %c1_i32 : i32
    %1 = arith.addi %0, %arg1 : i32
    %c0_i32 = arith.constant 0 : i32
    %c0_i32_0 = arith.constant 0 : i32
    return %c0_i32, %1 : i32, i32
  }
  func.func @transform_3(%arg0: i32, %arg1: i32) -> (i32, i32, i32) {
    %c0_i32 = arith.constant 0 : i32
    %c0_i32_0 = arith.constant 0 : i32
    %c0_i32_1 = arith.constant 0 : i32
    return %arg0, %c0_i32, %c0_i32_0 : i32, i32, i32
  }
  func.func @transform_4(%arg0: i32, %arg1: i32) -> (i32, i32, i32) {
    %c0_i32 = arith.constant 0 : i32
    %c0_i32_0 = arith.constant 0 : i32
    %c0_i32_1 = arith.constant 0 : i32
    return %arg0, %c0_i32, %c0_i32_0 : i32, i32, i32
  }
}

module attributes {stable_mosaic.version = 11 : i64} {
  func.func @_matmul_bias_tanh_kernel(%arg0: i32, %arg1: memref<98x2048xbf16, #tpu.memory_space<vmem>>, %arg2: memref<3x98xbf16, #tpu.memory_space<vmem>>, %arg3: memref<3x1xf32, #tpu.memory_space<vmem>>, %arg4: memref<3x2048xf32, #tpu.memory_space<vmem>>) attributes {dimension_semantics = [#tpu.dimension_semantics<parallel>], iteration_bounds = array<i64: 4>, scalar_prefetch = 0 : i64, scratch_operands = 0 : i64, tpu.core_type = #tpu.core_type<tc>, window_params = [{transform_indices = @transform_0, window_bounds = array<i64: 98, 2048>}, {pipeline_mode = #tpu.pipeline_mode<synchronous>, transform_indices = @transform_1, window_bounds = array<i64: 3, 98>}, {pipeline_mode = #tpu.pipeline_mode<synchronous>, transform_indices = @transform_2, window_bounds = array<i64: 3, 1>}, {transform_indices = @transform_3, window_bounds = array<i64: 3, 2048>}]} {
    %c0 = arith.constant 0 : index
    %c0_0 = arith.constant 0 : index
    %0 = vector.load %arg2[%c0, %c0_0] : memref<3x98xbf16, #tpu.memory_space<vmem>>, vector<3x98xbf16>
    %c0_1 = arith.constant 0 : index
    %c0_2 = arith.constant 0 : index
    %1 = vector.load %arg1[%c0_1, %c0_2] : memref<98x2048xbf16, #tpu.memory_space<vmem>>, vector<98x2048xbf16>
    %cst = arith.constant dense<0.000000e+00> : vector<3x2048xf32>
    %2 = tpu.matmul %0, %1, %cst {dimension_numbers = #tpu.dot_dimension_numbers<[1], [0], [0], [1], [0, 0, 1, 1], [], []>} : vector<3x98xbf16>, vector<98x2048xbf16>, vector<3x2048xf32> -> vector<3x2048xf32>
    %c0_3 = arith.constant 0 : index
    %c0_4 = arith.constant 0 : index
    %3 = vector.load %arg3[%c0_3, %c0_4] : memref<3x1xf32, #tpu.memory_space<vmem>>, vector<3x1xf32>
    %4 = vector.broadcast %3 : vector<3x1xf32> to vector<3x2048xf32>
    %5 = arith.addf %2, %4 : vector<3x2048xf32>
    %6 = math.tanh %5 : vector<3x2048xf32>
    %c0_5 = arith.constant 0 : index
    %c0_6 = arith.constant 0 : index
    %7 = vector.load %arg4[%c0_5, %c0_6] : memref<3x2048xf32, #tpu.memory_space<vmem>>, vector<3x2048xf32>
    tpu.vector_store %arg4[%c0_5, %c0_6], %6 {strides = array<i32>} : memref<3x2048xf32, #tpu.memory_space<vmem>>, vector<3x2048xf32>,
    return
  }
  func.func @transform_0(%arg0: i32) -> (i32, i32) {
    %c0_i32 = arith.constant 0 : i32
    %c0_i32_0 = arith.constant 0 : i32
    return %c0_i32, %arg0 : i32, i32
  }
  func.func @transform_1(%arg0: i32) -> (i32, i32) {
    %c0_i32 = arith.constant 0 : i32
    %c0_i32_0 = arith.constant 0 : i32
    %c0_i32_1 = arith.constant 0 : i32
    return %c0_i32, %c0_i32_0 : i32, i32
  }
  func.func @transform_2(%arg0: i32) -> (i32, i32) {
    %c0_i32 = arith.constant 0 : i32
    %c0_i32_0 = arith.constant 0 : i32
    %c0_i32_1 = arith.constant 0 : i32
    return %c0_i32, %c0_i32_0 : i32, i32
  }
  func.func @transform_3(%arg0: i32) -> (i32, i32) {
    %c0_i32 = arith.constant 0 : i32
    %c0_i32_0 = arith.constant 0 : i32
    return %c0_i32, %arg0 : i32, i32
  }
}

</mosaic_0001>

<bundles_post_ra>
// kernel: resnet_decoder_forward.7
= control target key start
LH: loop header
LB: loop body
LE: loop exit
PB: predicated region body
PF: predicated region fallthrough
CT: control target
= control target key end

     0   :  { %s722_s15 = smov 0   ;;  %s724_s16 = smov 0   ;;  %s817_s0 = inlined_call_operand.vmem [shape: bf16[72,512], index: 0, kind: input, shape index: {}]   ;;  %s818_s1 = inlined_call_operand.vmem [shape: bf16[8,72], index: 1, kind: input, shape index: {}]   ;;  %s819_s2 = inlined_call_operand.vmem [shape: f32[8,512], index: 2, kind: output, shape index: {0}]   ;;  %s820_s3 = inlined_call_operand.vmem [shape: f32[2,8,128], index: 3, kind: output, shape index: {1}]   ;;  %s821_s4 = inlined_call_operand.vmem [shape: f32[2,8,128], index: 4, kind: output, shape index: {2}]  }
   0x1   :  { %s726_s17 = smov 0   ;;  %s728_s18 = smov 0  }
   0x2   :  { %s730_s19 = smov 0  }
   0x3 LB: > { %s27_s20 = sadd.s32 1, %s691_s18  ;;  %p43_p1 = scmp.ne.s32.totalorder %s683_s16, %s679_s15  ;;  %s695_s19 = sphi %s730_s19, %s15_s19   ;;  %s691_s18 = sphi %s728_s18, %s825_s18   ;;  %s687_s17 = sphi %s726_s17, %s824_s17   ;;  %s683_s16 = sphi %s724_s16, %s823_s16   ;;  %s679_s15 = sphi %s722_s15, %s822_s15  }
   0x4   : > { %p29_p0 = scmp.ge.s32.totalorder %s27_s20, 2  ;;  %p44_p2 = scmp.eq.s32.totalorder %s695_s19, 0 }
   0x5   : > { %s36_s22 = sadd.s32 1, %s683_s16  ;;  %p561_p5 = scmp.ge.s32.totalorder %s695_s19, 2 }
   0x6   : > { %s827_s20 = smov (%p29_p0, %s27_s20), 0  ;;  %p45_p3 = por %p44_p2, %p43_p1 }
   0x7   : > { %s33_s21 = ssub.s32 %s691_s18, %s827_s20  ;;  %173 = sbr.rel (%p561_p5) target bundleno = 25 (0x19), region = 20 }
   0x8   : > { %p34_p4 = scmp.eq.s32.totalorder %s33_s21, 0 }
   0xa   : > { %s757_s23 = scalar_select %p34_p4, %s683_s16, %s36_s22  }
   0xc   : > { %176 = sbr.rel (!%p45_p3) target bundleno = 25 (0x19), region = 24  ;;  %s178_s24 = sand.u32 (%p45_p3), 1, %s683_s16  }
   0xd   : > { %s605_s25 = sshll.u32 (%p45_p3), %s691_s18, 3  ;;  %s614_s26 = smul.u32 (%p45_p3), 72, %s178_s24 }
   0xe   : > { %s184_s29 = scalar_lea.vmem (%p45_p3), %s817_s0, %s605_s25 }
   0xf   : > { %v229_v0 = vld [vmem:[%s184_s29] sm:$0xff] (%p45_p3)  ;;  %v231_v1 = vld [vmem:[%s184_s29 + $0x10] sm:$0xff] (%p45_p3)  ;;  %s180_s30 = scalar_lea.vmem (%p45_p3), [#allocation2], %s614_s26 }
  0x10   : > { %v233_v2 = vld [vmem:[%s184_s29 + $0x20] sm:$0xff] (%p45_p3)  ;;  %230 = vst [vmem:[%s180_s30] sm:$0xff] (%p45_p3), %v229_v0  ;;  %v235_v3 = vld [vmem:[%s184_s29 + $0x30] sm:$0xff] (%p45_p3) }
  0x11   : > { %232 = vst [vmem:[%s180_s30 + $0x8] sm:$0xff] %v231_v1  ;;  %v237_v4 = vld [vmem:[%s184_s29 + $0x40] sm:$0xff]  ;;  %v239_v5 = vld [vmem:[%s184_s29 + $0x50] sm:$0xff] }
  0x12   : > { %234 = vst [vmem:[%s180_s30 + $0x10] sm:$0xff] %v233_v2  ;;  %v241_v6 = vld [vmem:[%s184_s29 + $0x60] sm:$0xff]  ;;  %v243_v7 = vld [vmem:[%s184_s29 + $0x70] sm:$0xff] }
  0x13   : > { %236 = vst [vmem:[%s180_s30 + $0x18] sm:$0xff] %v235_v3  ;;  %v245_v8 = vld [vmem:[%s184_s29 + $0x80] sm:$0xff] }
  0x14   : > { %238 = vst [vmem:[%s180_s30 + $0x20] sm:$0xff] %v237_v4 }
  0x15   : > { %240 = vst [vmem:[%s180_s30 + $0x28] sm:$0xff] %v239_v5 }
  0x16   : > { %242 = vst [vmem:[%s180_s30 + $0x30] sm:$0xff] %v241_v6 }
  0x17   : > { %244 = vst [vmem:[%s180_s30 + $0x38] sm:$0xff] %v243_v7 }
  0x18   : > { %246 = vst [vmem:[%s180_s30 + $0x40] sm:$0xff] %v245_v8 }
  0x19 PF: > { %p564_p6 = scmp.ge.s32.totalorder %s695_s19, 1  ;;  %p251_p7 = scmp.lt.s32.totalorder %s695_s19, 3 }
  0x1b   : > { %p252_p8 = pnand %p564_p6, %p251_p7 }
  0x1c   : > { %s258_s5 = sand.u32 (!%p252_p8), 1, %s679_s15   ;;  %s565_s10 = sshll.u32 (!%p252_p8), %s687_s17, 1 }
  0x1d   : > { %255 = sbr.rel (%p252_p8) target bundleno = 193 (0xc1), region = 62  ;;  %p296_p9 = scmp.lt.s32.totalorder (!%p252_p8), %s565_s10, 3 }
  0x1e   : > { %s615_s6 = smul.u32 (!%p252_p8), 72, %s258_s5  ;;  %p302_p10 = scmp.lt.s32.totalorder (!%p252_p8), %s687_s17, 1 }
  0x20   : > { %s768_s7 = scalar_lea.vmem (!%p252_p8), [#allocation2], %s615_s6 }
  0x22   : > { %v326_v9 = vld [vmem:[%s768_s7 + $0x40] sm:$0xff]  ;;  %vm376_vm0 = vcmask 1043456   ;;  %v595_v12 = vld [vmem:[%s768_s7 + $0x30] sm:$0xf]  ;;  %v613_v15 = vld [vmem:[%s768_s7 + $0x34] sm:$0xf0] }
  0x23   : > { %v352_v10 = vunpack.c.l.b16 %v326_v9  ;;  %v353_v11 = vunpack.c.h.b16 %v326_v9  ;;  %v612_v16 = vld [vmem:[%s768_s7 + $0x34] sm:$0xf]  ;;  %v597_v17 = vld [vmem:[%s768_s7 + $0x38] sm:$0xf0]  ;;  %v596_v20 = vor.u32 %v613_v15, %v595_v12  ;;  %v587_v22 = vld [vmem:[%s768_s7 + $0x20] sm:$0xf] }
  0x24   : > { %v600_v21 = vor.u32 %v612_v16, %v597_v17  ;;  %v611_v23 = vld [vmem:[%s768_s7 + $0x24] sm:$0xf0]  ;;  %v610_v24 = vld [vmem:[%s768_s7 + $0x24] sm:$0xf]  ;;  %v589_v25 = vld [vmem:[%s768_s7 + $0x28] sm:$0xf0] }
  0x25   : > { %v362_v13 = vpack.c.b16 %v352_v10, %v352_v10  ;;  %v363_v14 = vpack.c.b16 %v353_v11, %v353_v11  ;;  %v588_v26 = vor.u32 %v611_v23, %v587_v22  ;;  %v592_v27 = vor.u32 %v610_v24, %v589_v25  ;;  %v579_v28 = vld [vmem:[%s768_s7 + $0x10] sm:$0xf]  ;;  %v609_v29 = vld [vmem:[%s768_s7 + $0x14] sm:$0xf0]  ;;  %v608_v30 = vld [vmem:[%s768_s7 + $0x14] sm:$0xf] }
  0x26   : > { %v581_v31 = vld [vmem:[%s768_s7 + $0x18] sm:$0xf0]  ;;  %v580_v32 = vor.u32 %v609_v29, %v579_v28  ;;  %v571_v34 = vld [vmem:[%s768_s7] sm:$0xf]  ;;  %v607_v35 = vld [vmem:[%s768_s7 + $0x4] sm:$0xf0] }
  0x27   : > { %v378_v18 = vsel %vm376_vm0, %v362_v13, 0  ;;  %v381_v19 = vsel %vm376_vm0, %v363_v14, 0  ;;  %v584_v33 = vor.u32 %v608_v30, %v581_v31  ;;  %v606_v36 = vld [vmem:[%s768_s7 + $0x4] sm:$0xf]  ;;  %v573_v37 = vld [vmem:[%s768_s7 + $0x8] sm:$0xf0]  ;;  %v572_v38 = vor.u32 %v607_v35, %v571_v34 }
  0x28   : > { %386 = vmatpush.bf16.msra.mxu0 %v378_v18  ;;  %399 = vmatpush.bf16.msra.mxu1 %v381_v19  ;;  %v576_v39 = vor.u32 %v606_v36, %v573_v37  ;;  %v317_v40 = vld [vmem:[%s818_s1] sm:$0xf]  ;;  %vm372_vm1 = vcmask 588800   ;;  %s829_s10 = smov (!%p296_p9, %s565_s10), 3  ;;  %s831_s17 = smov (!%p302_p10, %s687_s17), 1 }
  0x29   : > { %s566_s11 = sshll.u32 %s829_s10, 3  ;;  %s567_s15 = sshll.u32 %s831_s17, 3 }
  0x2a   : > { %s299_s14 = scalar_lea.vmem %s819_s2, %s566_s11  ;;  %s305_s24 = scalar_lea.vmem %s820_s3, %s567_s15 }
  0x2b   : > { %s309_s27 = scalar_lea.vmem %s821_s4, %s567_s15 }
  0x2c   : > { %387 = vmatpush.bf16.msra.mxu0 %v596_v20  ;;  %400 = vmatpush.bf16.msra.mxu1 %v600_v21 }
  0x30   : > { %388 = vmatpush.bf16.msra.mxu0 %v588_v26  ;;  %401 = vmatpush.bf16.msra.mxu1 %v592_v27 }
  0x34   : > { %389 = vmatpush.bf16.msra.mxu0 %v580_v32  ;;  %402 = vmatpush.bf16.msra.mxu1 %v584_v33 }
  0x38   : > { %390 = vmatpush.bf16.msra.mxu0 %v572_v38  ;;  %403 = vmatpush.bf16.msra.mxu1 %v576_v39 }
  0x3b   : > { %601 = vmatmul.msk.bf16.vlgmr.msra.gmra.mxu0 %vm372_vm1, %v317_v40  ;;  %602 = vmatmul.msk.bf16.vlgmr.msra.gmra.mxu1 %vm372_vm1, %v317_v40 }
  0xb8   : > { %v392_v41 = vpop.f32.mrf.mxu0  ;;  %v405_v42 = vpop.f32.mrf.mxu1 }
  0xb9   : > { %409 = vst [vmem:[%s299_s14] sm:$0xff] %v392_v41  ;;  %v411_v43 = vmul.f32 %v392_v41, %v392_v41  ;;  %v412_v44 = vadd.f32 %v405_v42, %v392_v41  ;;  %v413_v45 = vmul.f32 %v405_v42, %v405_v42 }
  0xba   : > { %410 = vst [vmem:[%s299_s14 + $0x8] sm:$0xff] %v405_v42 }
  0xbb   : > { %v414_v46 = vadd.f32 %v413_v45, %v411_v43  ;;  %417 = vst [vmem:[%s305_s24] sm:$0xff] %v412_v44 }
  0xbd   : > { %420 = vst [vmem:[%s309_s27] sm:$0xff] %v414_v46 }
  0xc0   : > { %v394_v47 = vpop.f32.mrf.mxu0  ;;  %v407_v48 = vpop.f32.mrf.mxu1 }
  0xc1 PF: > { %s15_s19 = sadd.s32 1, %s695_s19   ;;  %s822_s15 = smov %s683_s16 }
  0xc2   : > { %p12_p11 = scmp.ge.s32.totalorder %s15_s19, 4   ;;  %s823_s16 = smov %s757_s23 }
  0xc3   : > { %s824_s17 = smov %s691_s18  ;;  %s825_s18 = smov %s827_s20 }
  0xc4   :  { %14 = sbr.rel (!%p12_p11) target bundleno = 3 (0x3), region = 129 }

// kernel: tile.28
= control target key start
LH: loop header
LB: loop body
LE: loop exit
PB: predicated region body
PF: predicated region fallthrough
CT: control target
= control target key end

     0   :  { %s22_s0 = inlined_call_operand.vmem [shape: f32[4], index: 0, kind: input, shape index: {}]   ;;  %s23_s1 = inlined_call_operand.vmem [shape: f32[4,4], index: 1, kind: output, shape index: {}]  }
   0x1   :  { %v4_v0 = vld [vmem:[%s22_s0] ss:$0 sm:$0xff] }
   0x2   :  { %5 = vst [vmem:[%s23_s1] sm:$0xf] %v4_v0 }

// kernel: resnet_decoder_forward.11
= control target key start
LH: loop header
LB: loop body
LE: loop exit
PB: predicated region body
PF: predicated region fallthrough
CT: control target
= control target key end

     0   :  { %s782_s15 = smov 0   ;;  %s784_s16 = smov 0   ;;  %s888_s0 = inlined_call_operand.vmem [shape: bf16[72,512], index: 0, kind: input, shape index: {}]   ;;  %s889_s1 = inlined_call_operand.vmem [shape: bf16[16,72], index: 1, kind: input, shape index: {}]   ;;  %s890_s2 = inlined_call_operand.vmem [shape: f32[16,512], index: 2, kind: output, shape index: {0}]   ;;  %s891_s3 = inlined_call_operand.vmem [shape: f32[2,16,128], index: 3, kind: output, shape index: {1}]   ;;  %s892_s4 = inlined_call_operand.vmem [shape: f32[2,16,128], index: 4, kind: output, shape index: {2}]  }
   0x1   :  { %s786_s17 = smov 0   ;;  %s788_s18 = smov 0  }
   0x2   :  { %s790_s19 = smov 0  }
   0x3 LB: > { %s27_s20 = sadd.s32 1, %s751_s18  ;;  %s606_s21 = sadd.s32 4294967295, %s755_s19   ;;  %s755_s19 = sphi %s790_s19, %s15_s19   ;;  %s751_s18 = sphi %s788_s18, %s897_s18   ;;  %s747_s17 = sphi %s786_s17, %s896_s17   ;;  %s743_s16 = sphi %s784_s16, %s895_s16   ;;  %s739_s15 = sphi %s782_s15, %s894_s15  }
   0x4   : > { %p29_p0 = scmp.ge.s32.totalorder %s27_s20, 2  ;;  %p43_p1 = scmp.ne.s32.totalorder %s743_s16, %s739_s15 }
   0x5   : > { %p44_p2 = scmp.eq.s32.totalorder %s755_s19, 0  ;;  %p96_p4 = scmp.eq.s32.totalorder %s606_s21, 1 }
   0x6   : > { %s899_s20 = smov (%p29_p0, %s27_s20), 0  ;;  %s36_s23 = sadd.s32 1, %s743_s16 }
   0x7   : > { %p45_p3 = por %p44_p2, %p43_p1  ;;  %s33_s22 = ssub.s32 %s751_s18, %s899_s20 }
   0x8   : > { %p34_p5 = scmp.eq.s32.totalorder %s33_s22, 0  ;;  %p817_p6 = por %p96_p4, %p43_p1 }
   0x9   : > { %p609_p7 = scmp.ge.s32.totalorder %s755_s19, 2 }
   0xa   : > { %s822_s25 = scalar_select %p34_p5, %s743_s16, %s36_s23  }
   0xb   : > { %173 = sbr.rel (%p609_p7) target bundleno = 29 (0x1d), region = 20 }
  0x10   : > { %176 = sbr.rel (!%p45_p3) target bundleno = 29 (0x1d), region = 24  ;;  %s178_s26 = sand.u32 (%p45_p3), 1, %s743_s16  }
  0x11   : > { %s661_s27 = sshll.u32 (%p45_p3), %s751_s18, 3  ;;  %s674_s28 = smul.u32 (%p45_p3), 72, %s178_s26 }
  0x12   : > { %s184_s5 = scalar_lea.vmem (%p45_p3), %s888_s0, %s661_s27 }
  0x13   : > { %v229_v0 = vld [vmem:[%s184_s5] sm:$0xff] (%p45_p3)  ;;  %v231_v1 = vld [vmem:[%s184_s5 + $0x10] sm:$0xff] (%p45_p3)  ;;  %s180_s6 = scalar_lea.vmem (%p45_p3), [#allocation2], %s674_s28 }
  0x14   : > { %v233_v2 = vld [vmem:[%s184_s5 + $0x20] sm:$0xff] (%p45_p3)  ;;  %230 = vst [vmem:[%s180_s6] sm:$0xff] (%p45_p3), %v229_v0  ;;  %v235_v3 = vld [vmem:[%s184_s5 + $0x30] sm:$0xff] (%p45_p3) }
  0x15   : > { %232 = vst [vmem:[%s180_s6 + $0x8] sm:$0xff] %v231_v1  ;;  %v237_v4 = vld [vmem:[%s184_s5 + $0x40] sm:$0xff]  ;;  %v239_v5 = vld [vmem:[%s184_s5 + $0x50] sm:$0xff] }
  0x16   : > { %234 = vst [vmem:[%s180_s6 + $0x10] sm:$0xff] %v233_v2  ;;  %v241_v6 = vld [vmem:[%s184_s5 + $0x60] sm:$0xff]  ;;  %v243_v7 = vld [vmem:[%s184_s5 + $0x70] sm:$0xff] }
  0x17   : > { %236 = vst [vmem:[%s180_s6 + $0x18] sm:$0xff] %v235_v3  ;;  %v245_v8 = vld [vmem:[%s184_s5 + $0x80] sm:$0xff] }
  0x18   : > { %238 = vst [vmem:[%s180_s6 + $0x20] sm:$0xff] %v237_v4 }
  0x19   : > { %240 = vst [vmem:[%s180_s6 + $0x28] sm:$0xff] %v239_v5 }
  0x1a   : > { %242 = vst [vmem:[%s180_s6 + $0x30] sm:$0xff] %v241_v6 }
  0x1b   : > { %244 = vst [vmem:[%s180_s6 + $0x38] sm:$0xff] %v243_v7 }
  0x1c   : > { %246 = vst [vmem:[%s180_s6 + $0x40] sm:$0xff] %v245_v8 }
  0x1d PF: > { %p612_p8 = scmp.ge.s32.totalorder %s755_s19, 1  ;;  %p251_p9 = scmp.lt.s32.totalorder %s755_s19, 3 }
  0x1f   : > { %p252_p10 = pnand %p612_p8, %p251_p9 }
  0x20   : > { %s258_s7 = sand.u32 (!%p252_p10), 1, %s739_s15   ;;  %p296_p11 = scmp.lt.s32.totalorder (!%p252_p10), %s747_s17, 1 }
  0x21   : > { %255 = sbr.rel (%p252_p10) target bundleno = 207 (0xcf), region = 62  ;;  %s613_s12 = sshll.u32 (!%p252_p10), %s258_s7, 5 }
  0x22   : > { %s675_s8 = smul.u32 (!%p252_p10), 72, %s258_s7  ;;  %s277_s21 = scalar_lea.vmem (!%p252_p10), [#allocation3], %s613_s12 }
  0x24   : > { %s835_s9 = scalar_lea.vmem (!%p252_p10), [#allocation2], %s675_s8 }
  0x26   : > { %v325_v9 = vld [vmem:[%s835_s9 + $0x40] sm:$0xff]  ;;  %vm380_vm0 = vcmask 1043456   ;;  %v648_v12 = vld [vmem:[%s835_s9 + $0x30] sm:$0xf]  ;;  %v672_v15 = vld [vmem:[%s835_s9 + $0x34] sm:$0xf0] }
  0x27   : > { %v356_v10 = vunpack.c.l.b16 %v325_v9  ;;  %v357_v11 = vunpack.c.h.b16 %v325_v9  ;;  %v671_v16 = vld [vmem:[%s835_s9 + $0x34] sm:$0xf]  ;;  %v650_v17 = vld [vmem:[%s835_s9 + $0x38] sm:$0xf0]  ;;  %v649_v20 = vor.u32 %v672_v15, %v648_v12  ;;  %v640_v22 = vld [vmem:[%s835_s9 + $0x20] sm:$0xf] }
  0x28   : > { %v653_v21 = vor.u32 %v671_v16, %v650_v17  ;;  %v670_v23 = vld [vmem:[%s835_s9 + $0x24] sm:$0xf0]  ;;  %v669_v24 = vld [vmem:[%s835_s9 + $0x24] sm:$0xf]  ;;  %v642_v25 = vld [vmem:[%s835_s9 + $0x28] sm:$0xf0] }
  0x29   : > { %v366_v13 = vpack.c.b16 %v356_v10, %v356_v10  ;;  %v367_v14 = vpack.c.b16 %v357_v11, %v357_v11  ;;  %v641_v26 = vor.u32 %v670_v23, %v640_v22  ;;  %v645_v27 = vor.u32 %v669_v24, %v642_v25  ;;  %v632_v28 = vld [vmem:[%s835_s9 + $0x10] sm:$0xf]  ;;  %v668_v29 = vld [vmem:[%s835_s9 + $0x14] sm:$0xf0]  ;;  %v667_v30 = vld [vmem:[%s835_s9 + $0x14] sm:$0xf] }
  0x2a   : > { %v634_v31 = vld [vmem:[%s835_s9 + $0x18] sm:$0xf0]  ;;  %v633_v32 = vor.u32 %v668_v29, %v632_v28  ;;  %v624_v34 = vld [vmem:[%s835_s9] sm:$0xf]  ;;  %v666_v35 = vld [vmem:[%s835_s9 + $0x4] sm:$0xf0] }
  0x2b   : > { %v382_v18 = vsel %vm380_vm0, %v366_v13, 0  ;;  %v385_v19 = vsel %vm380_vm0, %v367_v14, 0  ;;  %v637_v33 = vor.u32 %v667_v30, %v634_v31  ;;  %v665_v36 = vld [vmem:[%s835_s9 + $0x4] sm:$0xf]  ;;  %v626_v37 = vld [vmem:[%s835_s9 + $0x8] sm:$0xf0]  ;;  %v625_v38 = vor.u32 %v666_v35, %v624_v34 }
  0x2c   : > { %390 = vmatpush.bf16.msra.mxu0 %v382_v18  ;;  %404 = vmatpush.bf16.msra.mxu1 %v385_v19  ;;  %v629_v39 = vor.u32 %v665_v36, %v626_v37  ;;  %v664_v40 = vld [vmem:[%s889_s1] sm:$0xff]  ;;  %vm376_vm1 = vcmask 588800   ;;  %s297_s13 = scalar_select %p296_p11, %s747_s17, 1 }
  0x2d   : > { %s673_s29 = sshll.u32 (%p817_p6), %s747_s17, 4 }
  0x2e   : > { %s662_s14 = sshll.u32 %s297_s13, 4  ;;  %s459_s6 = scalar_lea.vmem (%p817_p6), %s890_s2, %s673_s29 }
  0x2f   : > { %s300_s26 = scalar_lea.vmem %s891_s3, %s662_s14  ;;  %s305_s15 = scalar_lea.vmem %s892_s4, %s662_s14 }
  0x30   : > { %391 = vmatpush.bf16.msra.mxu0 %v649_v20  ;;  %405 = vmatpush.bf16.msra.mxu1 %v653_v21 }
  0x34   : > { %392 = vmatpush.bf16.msra.mxu0 %v641_v26  ;;  %406 = vmatpush.bf16.msra.mxu1 %v645_v27 }
  0x38   : > { %393 = vmatpush.bf16.msra.mxu0 %v633_v32  ;;  %407 = vmatpush.bf16.msra.mxu1 %v637_v33 }
  0x3c   : > { %394 = vmatpush.bf16.msra.mxu0 %v625_v38  ;;  %408 = vmatpush.bf16.msra.mxu1 %v629_v39 }
  0x3f   : > { %654 = vmatmul.msk.bf16.vlgmr.msra.gmra.mxu0 %vm376_vm1, %v664_v40  ;;  %655 = vmatmul.msk.bf16.vlgmr.msra.gmra.mxu1 %vm376_vm1, %v664_v40 }
  0xbc   : > { %v396_v41 = vpop.f32.mrf.mxu0  ;;  %v410_v42 = vpop.f32.mrf.mxu1 }
  0xbd   : > { %415 = vst [vmem:[%s277_s21] sm:$0xff] %v396_v41  ;;  %v419_v43 = vmul.f32 %v396_v41, %v396_v41  ;;  %v421_v44 = vadd.f32 %v410_v42, %v396_v41  ;;  %v423_v45 = vmul.f32 %v410_v42, %v410_v42 }
  0xbe   : > { %416 = vst [vmem:[%s277_s21 + $0x8] sm:$0xff] %v410_v42 }
  0xbf   : > { %v425_v46 = vadd.f32 %v423_v45, %v419_v43  ;;  %431 = vst [vmem:[%s300_s26] sm:$0xff] %v421_v44 }
  0xc1   : > { %437 = vst [vmem:[%s305_s15] sm:$0xff] %v425_v46 }
  0xc4   : > { %v398_v47 = vpop.f32.mrf.mxu0  ;;  %v412_v48 = vpop.f32.mrf.mxu1  ;;  %v472_v53 = vld [vmem:[%s277_s21] sm:$0xff] (%p817_p6) }
  0xc5   : > { %417 = vst [vmem:[%s277_s21 + $0x10] sm:$0xff] %v398_v47  ;;  %v420_v49 = vmul.f32 %v398_v47, %v398_v47  ;;  %v422_v50 = vadd.f32 %v412_v48, %v398_v47  ;;  %v424_v51 = vmul.f32 %v412_v48, %v412_v48  ;;  %455 = sbr.rel (!%p817_p6) target bundleno = 207 (0xcf), region = 74  ;;  %v474_v54 = vld [vmem:[%s277_s21 + $0x8] sm:$0xff] (%p817_p6) }
  0xc6   : > { %418 = vst [vmem:[%s277_s21 + $0x18] sm:$0xff] %v412_v48 }
  0xc7   : > { %v426_v52 = vadd.f32 %v424_v51, %v420_v49  ;;  %432 = vst [vmem:[%s300_s26 + $0x8] sm:$0xff] %v422_v50 }
  0xc8   : > { %473 = vst [vmem:[%s459_s6] sm:$0xff] (%p817_p6), %v472_v53 }
  0xc9   : > { %438 = vst [vmem:[%s305_s15 + $0x8] sm:$0xff] %v426_v52 }
  0xca   : > { %475 = vst [vmem:[%s459_s6 + $0x8] sm:$0xff] %v474_v54 }
  0xcc   : > { %v476_v55 = vld [vmem:[%s277_s21 + $0x10] sm:$0xff] }
  0xcd   : > { %v478_v56 = vld [vmem:[%s277_s21 + $0x18] sm:$0xff]  ;;  %477 = vst [vmem:[%s459_s6 + $0x20] sm:$0xff] %v476_v55 }
  0xce   : > { %479 = vst [vmem:[%s459_s6 + $0x28] sm:$0xff] %v478_v56 }
  0xcf PF: > { %s15_s19 = sadd.s32 1, %s755_s19   ;;  %s894_s15 = smov %s743_s16 }
  0xd0   : > { %p12_p12 = scmp.ge.s32.totalorder %s15_s19, 4   ;;  %s895_s16 = smov %s822_s25 }
  0xd1   : > { %s896_s17 = smov %s751_s18  ;;  %s897_s18 = smov %s899_s20 }
  0xd2   :  { %14 = sbr.rel (!%p12_p12) target bundleno = 3 (0x3), region = 152 }

// kernel: resnet_decoder_forward.12
= control target key start
LH: loop header
LB: loop body
LE: loop exit
PB: predicated region body
PF: predicated region fallthrough
CT: control target
= control target key end

     0   :  { %s944_s15 = smov 0   ;;  %s946_s16 = smov 0   ;;  %s1128_s0 = inlined_call_operand.vmem [shape: bf16[36,2048], index: 0, kind: input, shape index: {}]   ;;  %s1129_s1 = inlined_call_operand.vmem [shape: bf16[8,36], index: 1, kind: input, shape index: {}]   ;;  %s1130_s2 = inlined_call_operand.vmem [shape: f32[8,2048], index: 2, kind: output, shape index: {0}]   ;;  %s1131_s3 = inlined_call_operand.vmem [shape: f32[2,8,128], index: 3, kind: output, shape index: {1}]   ;;  %s1132_s4 = inlined_call_operand.vmem [shape: f32[2,8,128], index: 4, kind: output, shape index: {2}]  }
   0x1   :  { %s948_s17 = smov 0   ;;  %s950_s18 = smov 0  }
   0x2   :  { %s952_s19 = smov 0  }
   0x3 LB: > { %s27_s20 = sadd.s32 1, %s913_s18  ;;  %p43_p1 = scmp.ne.s32.totalorder %s905_s16, %s901_s15  ;;  %s917_s19 = sphi %s952_s19, %s15_s19   ;;  %s913_s18 = sphi %s950_s18, %s1136_s18   ;;  %s909_s17 = sphi %s948_s17, %s1135_s17   ;;  %s905_s16 = sphi %s946_s16, %s1134_s16   ;;  %s901_s15 = sphi %s944_s15, %s1133_s15  }
   0x4   : > { %p29_p0 = scmp.ge.s32.totalorder %s27_s20, 2  ;;  %p44_p2 = scmp.eq.s32.totalorder %s917_s19, 0 }
   0x5   : > { %s36_s22 = sadd.s32 1, %s905_s16  ;;  %p737_p5 = scmp.ge.s32.totalorder %s917_s19, 2 }
   0x6   : > { %s1138_s20 = smov (%p29_p0, %s27_s20), 0  ;;  %p45_p3 = por %p44_p2, %p43_p1 }
   0x7   : > { %s33_s21 = ssub.s32 %s913_s18, %s1138_s20  ;;  %173 = sbr.rel (%p737_p5) target bundleno = 36 (0x24), region = 20 }
   0x8   : > { %p34_p4 = scmp.eq.s32.totalorder %s33_s21, 0 }
   0xa   : > { %s979_s23 = scalar_select %p34_p4, %s905_s16, %s36_s22  }
   0xc   : > { %176 = sbr.rel (!%p45_p3) target bundleno = 36 (0x24), region = 24  ;;  %s178_s24 = sand.u32 (%p45_p3), 1, %s905_s16  }
   0xd   : > { %s819_s25 = sshll.u32 (%p45_p3), %s913_s18, 5  ;;  %s836_s26 = smul.u32 (%p45_p3), 160, %s178_s24 }
   0xe   : > { %s987_s29 = scalar_lea.vmem (%p45_p3), %s1128_s0, %s819_s25 }
   0xf   : > { %v197_v0 = vld [vmem:[%s987_s29] sm:$0xff] (%p45_p3)  ;;  %v199_v1 = vld [vmem:[%s987_s29 + $0x8] sm:$0xff] (%p45_p3)  ;;  %v201_v2 = vld [vmem:[%s987_s29 + $0x10] sm:$0xff] (%p45_p3)  ;;  %s992_s30 = scalar_lea.vmem (%p45_p3), [#allocation2], %s836_s26 }
  0x10   : > { %198 = vst [vmem:[%s992_s30] sm:$0xff] (%p45_p3), %v197_v0  ;;  %v203_v3 = vld [vmem:[%s987_s29 + $0x18] sm:$0xff] (%p45_p3)  ;;  %v205_v4 = vld [vmem:[%s987_s29 + $0x40] sm:$0xff] (%p45_p3)  ;;  %v207_v5 = vld [vmem:[%s987_s29 + $0x48] sm:$0xff] (%p45_p3) }
  0x11   : > { %200 = vst [vmem:[%s992_s30 + $0x8] sm:$0xff] %v199_v1  ;;  %v209_v6 = vld [vmem:[%s987_s29 + $0x50] sm:$0xff]  ;;  %v211_v7 = vld [vmem:[%s987_s29 + $0x58] sm:$0xff]  ;;  %v213_v8 = vld [vmem:[%s987_s29 + $0x80] sm:$0xff] }
  0x12   : > { %202 = vst [vmem:[%s992_s30 + $0x10] sm:$0xff] %v201_v2  ;;  %v215_v9 = vld [vmem:[%s987_s29 + $0x88] sm:$0xff]  ;;  %v217_v10 = vld [vmem:[%s987_s29 + $0x90] sm:$0xff]  ;;  %v219_v11 = vld [vmem:[%s987_s29 + $0x98] sm:$0xff] }
  0x13   : > { %204 = vst [vmem:[%s992_s30 + $0x18] sm:$0xff] %v203_v3  ;;  %v221_v12 = vld [vmem:[%s987_s29 + $0xc0] sm:$0xff]  ;;  %v223_v13 = vld [vmem:[%s987_s29 + $0xc8] sm:$0xff]  ;;  %v225_v14 = vld [vmem:[%s987_s29 + $0xd0] sm:$0xff] }
  0x14   : > { %206 = vst [vmem:[%s992_s30 + $0x20] sm:$0xff] %v205_v4  ;;  %v227_v15 = vld [vmem:[%s987_s29 + $0xd8] sm:$0xff]  ;;  %v229_v16 = vld [vmem:[%s987_s29 + $0x100] sm:$0xff]  ;;  %v231_v17 = vld [vmem:[%s987_s29 + $0x108] sm:$0xff] }
  0x15   : > { %208 = vst [vmem:[%s992_s30 + $0x28] sm:$0xff] %v207_v5  ;;  %v233_v18 = vld [vmem:[%s987_s29 + $0x110] sm:$0xff]  ;;  %v235_v19 = vld [vmem:[%s987_s29 + $0x118] sm:$0xff] }
  0x16   : > { %210 = vst [vmem:[%s992_s30 + $0x30] sm:$0xff] %v209_v6 }
  0x17   : > { %212 = vst [vmem:[%s992_s30 + $0x38] sm:$0xff] %v211_v7 }
  0x18   : > { %214 = vst [vmem:[%s992_s30 + $0x40] sm:$0xff] %v213_v8 }
  0x19   : > { %216 = vst [vmem:[%s992_s30 + $0x48] sm:$0xff] %v215_v9 }
  0x1a   : > { %218 = vst [vmem:[%s992_s30 + $0x50] sm:$0xff] %v217_v10 }
  0x1b   : > { %220 = vst [vmem:[%s992_s30 + $0x58] sm:$0xff] %v219_v11 }
  0x1c   : > { %222 = vst [vmem:[%s992_s30 + $0x60] sm:$0xff] %v221_v12 }
  0x1d   : > { %224 = vst [vmem:[%s992_s30 + $0x68] sm:$0xff] %v223_v13 }
  0x1e   : > { %226 = vst [vmem:[%s992_s30 + $0x70] sm:$0xff] %v225_v14 }
  0x1f   : > { %228 = vst [vmem:[%s992_s30 + $0x78] sm:$0xff] %v227_v15 }
  0x20   : > { %230 = vst [vmem:[%s992_s30 + $0x80] sm:$0xff] %v229_v16 }
  0x21   : > { %232 = vst [vmem:[%s992_s30 + $0x88] sm:$0xff] %v231_v17 }
  0x22   : > { %234 = vst [vmem:[%s992_s30 + $0x90] sm:$0xff] %v233_v18 }
  0x23   : > { %236 = vst [vmem:[%s992_s30 + $0x98] sm:$0xff] %v235_v19 }
  0x24 PF: > { %p740_p6 = scmp.ge.s32.totalorder %s917_s19, 1  ;;  %p241_p7 = scmp.lt.s32.totalorder %s917_s19, 3 }
  0x26   : > { %p242_p8 = pnand %p740_p6, %p241_p7 }
  0x27   : > { %s248_s5 = sand.u32 (!%p242_p8), 1, %s901_s15   ;;  %s741_s10 = sshll.u32 (!%p242_p8), %s909_s17, 3 }
  0x28   : > { %245 = sbr.rel (%p242_p8) target bundleno = 219 (0xdb), region = 47  ;;  %p286_p9 = scmp.lt.s32.totalorder (!%p242_p8), %s741_s10, 15 }
  0x29   : > { %s837_s6 = smul.u32 (!%p242_p8), 160, %s248_s5  ;;  %p292_p10 = scmp.lt.s32.totalorder (!%p242_p8), %s909_s17, 1 }
  0x2b   : > { %s1034_s7 = scalar_lea.vmem (!%p242_p8), [#allocation2], %s837_s6 }
  0x2d   : > { %v324_v20 = vld [vmem:[%s1034_s7 + $0x80] sm:$0x33]  ;;  %v325_v21 = vld [vmem:[%s1034_s7 + $0x88] sm:$0x33]  ;;  %vm432_vm0 = vcmask 1041408   ;;  %vm428_vm1 = vcmask 293888  }
  0x2e   : > { %v380_v22 = vunpack.c.l.b16 %v324_v20  ;;  %v381_v23 = vunpack.c.h.b16 %v324_v20  ;;  %v382_v24 = vunpack.c.l.b16 %v325_v21  ;;  %v383_v25 = vunpack.c.h.b16 %v325_v21  ;;  %v779_v26 = vld [vmem:[%s1034_s7 + $0x40] sm:$0xf]  ;;  %v828_v32 = vld [vmem:[%s1034_s7 + $0x44] sm:$0xf]  ;;  %v787_v34 = vld [vmem:[%s1034_s7 + $0x48] sm:$0xf] }
  0x2f   : > { %v832_v27 = vld [vmem:[%s1034_s7 + $0x5c] sm:$0xf0]  ;;  %v781_v33 = vld [vmem:[%s1034_s7 + $0x60] sm:$0xf0]  ;;  %v833_v35 = vld [vmem:[%s1034_s7 + $0x64] sm:$0xf0] }
  0x30   : > { %v404_v28 = vpack.c.b16 %v380_v22, %v380_v22  ;;  %v405_v29 = vpack.c.b16 %v381_v23, %v381_v23  ;;  %v406_v30 = vpack.c.b16 %v382_v24, %v382_v24  ;;  %v407_v31 = vpack.c.b16 %v383_v25, %v383_v25  ;;  %v829_v36 = vld [vmem:[%s1034_s7 + $0x4c] sm:$0xf]  ;;  %v747_v42 = vld [vmem:[%s1034_s7] sm:$0xf]  ;;  %v820_v46 = vld [vmem:[%s1034_s7 + $0x4] sm:$0xf] }
  0x31   : > { %v789_v37 = vld [vmem:[%s1034_s7 + $0x68] sm:$0xf0]  ;;  %v780_v43 = vor.u32 %v832_v27, %v779_v26  ;;  %v784_v44 = vor.u32 %v828_v32, %v781_v33  ;;  %v824_v45 = vld [vmem:[%s1034_s7 + $0x1c] sm:$0xf0]  ;;  %v327_v47 = vld [vmem:[%s1034_s7 + $0x98] sm:$0x33]  ;;  %v788_v48 = vor.u32 %v833_v35, %v787_v34 }
  0x32   : > { %v434_v38 = vsel %vm432_vm0, %v404_v28, 0  ;;  %v437_v39 = vsel %vm432_vm0, %v405_v29, 0  ;;  %v440_v40 = vsel %vm432_vm0, %v406_v30, 0  ;;  %v443_v41 = vsel %vm432_vm0, %v407_v31, 0  ;;  %v749_v50 = vld [vmem:[%s1034_s7 + $0x20] sm:$0xf0] }
  0x33   : > { %462 = vmatpush.bf16.msra.mxu0 %v434_v38  ;;  %475 = vmatpush.bf16.msra.mxu1 %v437_v39  ;;  %v792_v49 = vor.u32 %v829_v36, %v789_v37  ;;  %v755_v51 = vld [vmem:[%s1034_s7 + $0x8] sm:$0xf]  ;;  %v386_v52 = vunpack.c.l.b16 %v327_v47  ;;  %v387_v53 = vunpack.c.h.b16 %v327_v47  ;;  %v326_v54 = vld [vmem:[%s1034_s7 + $0x90] sm:$0x33]  ;;  %v821_v56 = vld [vmem:[%s1034_s7 + $0xc] sm:$0xf]  ;;  %v748_v62 = vor.u32 %v824_v45, %v747_v42 }
  0x34   : > { %488 = vmatpush.bf16.msra.mxu2 %v440_v40  ;;  %501 = vmatpush.bf16.msra.mxu3 %v443_v41  ;;  %v825_v55 = vld [vmem:[%s1034_s7 + $0x24] sm:$0xf0]  ;;  %v757_v57 = vld [vmem:[%s1034_s7 + $0x28] sm:$0xf0]  ;;  %v384_v58 = vunpack.c.l.b16 %v326_v54  ;;  %v385_v59 = vunpack.c.h.b16 %v326_v54  ;;  %v752_v63 = vor.u32 %v820_v46, %v749_v50  ;;  %v803_v4 = vld [vmem:[%s1034_s7 + $0x58] sm:$0xf] }
  0x35   : > { %v410_v60 = vpack.c.b16 %v386_v52, %v386_v52  ;;  %v411_v61 = vpack.c.b16 %v387_v53, %v387_v53  ;;  %v756_v0 = vor.u32 %v825_v55, %v755_v51  ;;  %v760_v1 = vor.u32 %v821_v56, %v757_v57  ;;  %v835_v5 = vld [vmem:[%s1034_s7 + $0x74] sm:$0xf0]  ;;  %v831_v8 = vld [vmem:[%s1034_s7 + $0x5c] sm:$0xf]  ;;  %v307_v10 = vld [vmem:[%s1129_s1] sm:$0xf] }
  0x36   : > { %v408_v2 = vpack.c.b16 %v384_v58, %v384_v58  ;;  %v409_v3 = vpack.c.b16 %v385_v59, %v385_v59  ;;  %v805_v9 = vld [vmem:[%s1034_s7 + $0x78] sm:$0xf0]  ;;  %v795_v11 = vld [vmem:[%s1034_s7 + $0x50] sm:$0xf]  ;;  %v830_v13 = vld [vmem:[%s1034_s7 + $0x54] sm:$0xf]  ;;  %v804_v16 = vor.u32 %v835_v5, %v803_v4 }
  0x37   : > { %463 = vmatpush.bf16.msra.mxu0 %v780_v43  ;;  %476 = vmatpush.bf16.msra.mxu1 %v784_v44  ;;  %v452_v6 = vsel %vm432_vm0, %v410_v60, 0  ;;  %v455_v7 = vsel %vm432_vm0, %v411_v61, 0  ;;  %v834_v12 = vld [vmem:[%s1034_s7 + $0x6c] sm:$0xf0]  ;;  %v808_v17 = vor.u32 %v831_v8, %v805_v9  ;;  %v797_v18 = vld [vmem:[%s1034_s7 + $0x70] sm:$0xf0] }
  0x38   : > { %489 = vmatpush.bf16.msra.mxu2 %v788_v48  ;;  %502 = vmatpush.bf16.msra.mxu3 %v792_v49  ;;  %v446_v14 = vsel %vm432_vm0, %v408_v2, 0  ;;  %v449_v15 = vsel %vm432_vm0, %v409_v3, 0  ;;  %v771_v19 = vld [vmem:[%s1034_s7 + $0x18] sm:$0xf]  ;;  %v823_v21 = vld [vmem:[%s1034_s7 + $0x1c] sm:$0xf]  ;;  %v796_v23 = vor.u32 %v834_v12, %v795_v11  ;;  %v800_v24 = vor.u32 %v830_v13, %v797_v18 }
  0x39   : > { %v827_v20 = vld [vmem:[%s1034_s7 + $0x34] sm:$0xf0]  ;;  %v773_v22 = vld [vmem:[%s1034_s7 + $0x38] sm:$0xf0]  ;;  %v763_v25 = vld [vmem:[%s1034_s7 + $0x10] sm:$0xf] }
  0x3a   : > { %v772_v26 = vor.u32 %v827_v20, %v771_v19  ;;  %v776_v27 = vor.u32 %v823_v21, %v773_v22  ;;  %v826_v28 = vld [vmem:[%s1034_s7 + $0x2c] sm:$0xf0]  ;;  %v822_v29 = vld [vmem:[%s1034_s7 + $0x14] sm:$0xf]  ;;  %s1140_s10 = smov (!%p286_p9, %s741_s10), 15  ;;  %s1142_s17 = smov (!%p292_p10, %s909_s17), 1 }
  0x3b   : > { %464 = vmatpush.bf16.msra.mxu0 %v748_v62  ;;  %477 = vmatpush.bf16.msra.mxu1 %v752_v63  ;;  %v765_v30 = vld [vmem:[%s1034_s7 + $0x30] sm:$0xf0]  ;;  %v764_v31 = vor.u32 %v826_v28, %v763_v25  ;;  %s742_s11 = sshll.u32 %s1140_s10, 3  ;;  %s743_s15 = sshll.u32 %s1142_s17, 3 }
  0x3c   : > { %490 = vmatpush.bf16.msra.mxu2 %v756_v0  ;;  %503 = vmatpush.bf16.msra.mxu3 %v760_v1  ;;  %v768_v32 = vor.u32 %v822_v29, %v765_v30  ;;  %s1095_s14 = scalar_lea.vmem %s1130_s2, %s742_s11  ;;  %s295_s24 = scalar_lea.vmem %s1131_s3, %s743_s15 }
  0x3d   : > { %s299_s27 = scalar_lea.vmem %s1132_s4, %s743_s15 }
  0x3e   : > { %809 = vmatmul.msk.bf16.vlgmr.msra.gmra.mxu0 %vm428_vm1, %v307_v10  ;;  %810 = vmatmul.msk.bf16.vlgmr.msra.gmra.mxu1 %vm428_vm1, %v307_v10 }
  0x3f   : > { %811 = vmatmul.msk.bf16.vlgmr.msra.gmra.mxu2 %vm428_vm1, %v307_v10  ;;  %812 = vmatmul.msk.bf16.vlgmr.msra.gmra.mxu3 %vm428_vm1, %v307_v10 }
  0x40   : > { %540 = vmatpush.bf16.msrb.mxu2 %v452_v6  ;;  %553 = vmatpush.bf16.msrb.mxu3 %v455_v7 }
  0x41   : > { %514 = vmatpush.bf16.msrb.mxu0 %v446_v14  ;;  %527 = vmatpush.bf16.msrb.mxu1 %v449_v15 }
  0x44   : > { %541 = vmatpush.bf16.msrb.mxu2 %v804_v16  ;;  %554 = vmatpush.bf16.msrb.mxu3 %v808_v17 }
  0x45   : > { %515 = vmatpush.bf16.msrb.mxu0 %v796_v23  ;;  %528 = vmatpush.bf16.msrb.mxu1 %v800_v24 }
  0x48   : > { %542 = vmatpush.bf16.msrb.mxu2 %v772_v26  ;;  %555 = vmatpush.bf16.msrb.mxu3 %v776_v27 }
  0x49   : > { %516 = vmatpush.bf16.msrb.mxu0 %v764_v31  ;;  %529 = vmatpush.bf16.msrb.mxu1 %v768_v32 }
  0x4e   : > { %813 = vmatmul.msk.bf16.vlgmr.msrb.gmra.mxu0 %vm428_vm1, %v307_v10  ;;  %814 = vmatmul.msk.bf16.vlgmr.msrb.gmra.mxu1 %vm428_vm1, %v307_v10 }
  0x4f   : > { %815 = vmatmul.msk.bf16.vlgmr.msrb.gmra.mxu2 %vm428_vm1, %v307_v10  ;;  %816 = vmatmul.msk.bf16.vlgmr.msrb.gmra.mxu3 %vm428_vm1, %v307_v10 }
  0xbb   : > { %v466_v33 = vpop.f32.mrf.mxu0  ;;  %v479_v34 = vpop.f32.mrf.mxu1 }
  0xbc   : > { %561 = vst [vmem:[%s1095_s14] sm:$0xff] %v466_v33  ;;  %v569_v37 = vmul.f32 %v466_v33, %v466_v33  ;;  %v571_v38 = vmul.f32 %v479_v34, %v479_v34  ;;  %v570_v41 = vadd.f32 %v479_v34, %v466_v33 }
  0xbd   : > { %562 = vst [vmem:[%s1095_s14 + $0x8] sm:$0xff] %v479_v34 }
  0xbe   : > { %v572_v43 = vadd.f32 %v571_v38, %v569_v37 }
  0xc2   : > { %v492_v35 = vpop.f32.mrf.mxu2  ;;  %v505_v36 = vpop.f32.mrf.mxu3 }
  0xc3   : > { %563 = vst [vmem:[%s1095_s14 + $0x10] sm:$0xff] %v492_v35  ;;  %v468_v39 = vpop.f32.mrf.mxu0  ;;  %v481_v40 = vpop.f32.mrf.mxu1  ;;  %v574_v42 = vmul.f32 %v492_v35, %v492_v35  ;;  %v573_v44 = vadd.f32 %v570_v41, %v492_v35  ;;  %v577_v46 = vmul.f32 %v505_v36, %v505_v36 }
  0xc4   : > { %564 = vst [vmem:[%s1095_s14 + $0x18] sm:$0xff] %v505_v36 }
  0xc5   : > { %v575_v45 = vadd.f32 %v574_v42, %v572_v43  ;;  %v576_v49 = vadd.f32 %v573_v44, %v505_v36 }
  0xc7   : > { %v578_v53 = vadd.f32 %v577_v46, %v575_v45 }
  0xca   : > { %v494_v47 = vpop.f32.mrf.mxu2  ;;  %v507_v48 = vpop.f32.mrf.mxu3 }
  0xcb   : > { %v518_v50 = vpop.f32.mrf.mxu0  ;;  %v531_v51 = vpop.f32.mrf.mxu1 }
  0xcc   : > { %565 = vst [vmem:[%s1095_s14 + $0x20] sm:$0xff] %v518_v50  ;;  %v580_v52 = vmul.f32 %v518_v50, %v518_v50  ;;  %v579_v54 = vadd.f32 %v576_v49, %v518_v50  ;;  %v583_v56 = vmul.f32 %v531_v51, %v531_v51 }
  0xcd   : > { %566 = vst [vmem:[%s1095_s14 + $0x28] sm:$0xff] %v531_v51 }
  0xce   : > { %v581_v55 = vadd.f32 %v580_v52, %v578_v53  ;;  %v582_v57 = vadd.f32 %v579_v54, %v531_v51 }
  0xd0   : > { %v584_v60 = vadd.f32 %v583_v56, %v581_v55 }
  0xd2   : > { %v544_v58 = vpop.f32.mrf.mxu2  ;;  %v557_v59 = vpop.f32.mrf.mxu3 }
  0xd3   : > { %567 = vst [vmem:[%s1095_s14 + $0x30] sm:$0xff] %v544_v58  ;;  %v585_v61 = vadd.f32 %v582_v57, %v544_v58  ;;  %v586_v62 = vmul.f32 %v544_v58, %v544_v58  ;;  %v589_v63 = vmul.f32 %v557_v59, %v557_v59  ;;  %v520_v0 = vpop.f32.mrf.mxu0  ;;  %v533_v1 = vpop.f32.mrf.mxu1 }
  0xd4   : > { %568 = vst [vmem:[%s1095_s14 + $0x38] sm:$0xff] %v557_v59 }
  0xd5   : > { %v587_v2 = vadd.f32 %v586_v62, %v584_v60  ;;  %v588_v3 = vadd.f32 %v585_v61, %v557_v59 }
  0xd7   : > { %v590_v4 = vadd.f32 %v589_v63, %v587_v2  ;;  %593 = vst [vmem:[%s295_s24] sm:$0xff] %v588_v3 }
  0xd9   : > { %596 = vst [vmem:[%s299_s27] sm:$0xff] %v590_v4 }
  0xda   : > { %v546_v5 = vpop.f32.mrf.mxu2  ;;  %v559_v6 = vpop.f32.mrf.mxu3 }
  0xdb PF: > { %s15_s19 = sadd.s32 1, %s917_s19   ;;  %s1133_s15 = smov %s905_s16 }
  0xdc   : > { %p12_p11 = scmp.ge.s32.totalorder %s15_s19, 4   ;;  %s1134_s16 = smov %s979_s23 }
  0xdd   : > { %s1135_s17 = smov %s913_s18  ;;  %s1136_s18 = smov %s1138_s20 }
  0xde   :  { %14 = sbr.rel (!%p12_p11) target bundleno = 3 (0x3), region = 114 }

// kernel: tile.38
= control target key start
LH: loop header
LB: loop body
LE: loop exit
PB: predicated region body
PF: predicated region fallthrough
CT: control target
= control target key end

     0   :  { %s22_s0 = inlined_call_operand.vmem [shape: f32[2], index: 0, kind: input, shape index: {}]   ;;  %s23_s1 = inlined_call_operand.vmem [shape: f32[4,2], index: 1, kind: output, shape index: {}]  }
   0x1   :  { %v4_v0 = vld [vmem:[%s22_s0] ss:$0 sm:$0xff] }
   0x2   :  { %5 = vst [vmem:[%s23_s1] sm:$0xf] %v4_v0 }

// kernel: resnet_decoder_forward.13
= control target key start
LH: loop header
LB: loop body
LE: loop exit
PB: predicated region body
PF: predicated region fallthrough
CT: control target
= control target key end

     0   :  { %s2032_s12 = smov 0   ;;  %s2034_s13 = smov 0   ;;  %s2590_s0 = inlined_call_operand.vmem [shape: bf16[98,8192], index: 0, kind: input, shape index: {}]   ;;  %s2591_s1 = inlined_call_operand.vmem [shape: bf16[3,98], index: 1, kind: input, shape index: {}]   ;;  %s2592_s2 = inlined_call_operand.vmem [shape: f32[3,1], index: 2, kind: input, shape index: {}]   ;;  %s2593_s3 = inlined_call_operand.vmem [shape: f32[3,8192], index: 3, kind: output, shape index: {}]  }
   0x1   :  { %s2036_s14 = smov 0  }
   0x2 LB: > { %s1419_s15 = sadd.s32 4294967295, %s2009_s14   ;;  %s2049_s16 = sadd.s32 1, %s2009_s14   ;;  %s2009_s14 = sphi %s2036_s14, %s2596_s14   ;;  %s2005_s13 = sphi %s2034_s13, %s2595_s13   ;;  %s2001_s12 = sphi %s2032_s12, %s2594_s12  }
   0x3   : > { %s17_s17 = ssub.s32 %s2009_s14, %s2049_s16  ;;  %s20_s18 = sadd.s32 1, %s2005_s13 }
   0x4   : > { %p18_p0 = scmp.eq.s32.totalorder %s17_s17, 0  ;;  %p27_p1 = scmp.ne.s32.totalorder %s2005_s13, %s2001_s12 }
   0x5   : > { %p28_p2 = scmp.eq.s32.totalorder %s2009_s14, 0  ;;  %p1422_p4 = scmp.ge.s32.totalorder %s2009_s14, 4 }
   0x6   : > { %s2058_s19 = scalar_select %p18_p0, %s2005_s13, %s20_s18  }
   0x7   : > { %p29_p3 = por %p28_p2, %p27_p1  ;;  %127 = sbr.rel (%p1422_p4) target bundleno = 120 (0x78), region = 24 }
   0xc   : > { %130 = sbr.rel (!%p29_p3) target bundleno = 120 (0x78), region = 28  ;;  %s132_s20 = sand.u32 (%p29_p3), 1, %s2005_s13  }
   0xd   : > { %s1830_s21 = sshll.u32 (%p29_p3), %s2009_s14, 6  ;;  %s1927_s22 = smul.u32 (%p29_p3), 832, %s132_s20 }
   0xe   : > { %s2066_s25 = scalar_lea.vmem (%p29_p3), %s2590_s0, %s1830_s21 }
   0xf   : > { %v150_v0 = vld [vmem:[%s2066_s25] sm:$0xff] (%p29_p3)  ;;  %v152_v1 = vld [vmem:[%s2066_s25 + $0x8] sm:$0xff] (%p29_p3)  ;;  %v154_v2 = vld [vmem:[%s2066_s25 + $0x10] sm:$0xff] (%p29_p3)  ;;  %s2071_s26 = scalar_lea.vmem (%p29_p3), [#allocation2], %s1927_s22 }
  0x10   : > { %151 = vst [vmem:[%s2071_s26] sm:$0xff] (%p29_p3), %v150_v0  ;;  %v156_v3 = vld [vmem:[%s2066_s25 + $0x18] sm:$0xff] (%p29_p3)  ;;  %v158_v4 = vld [vmem:[%s2066_s25 + $0x20] sm:$0xff] (%p29_p3)  ;;  %v160_v5 = vld [vmem:[%s2066_s25 + $0x28] sm:$0xff] (%p29_p3) }
  0x11   : > { %153 = vst [vmem:[%s2071_s26 + $0x8] sm:$0xff] %v152_v1  ;;  %v162_v6 = vld [vmem:[%s2066_s25 + $0x30] sm:$0xff]  ;;  %v164_v7 = vld [vmem:[%s2066_s25 + $0x38] sm:$0xff]  ;;  %v166_v8 = vld [vmem:[%s2066_s25 + $0x100] sm:$0xff] }
  0x12   : > { %155 = vst [vmem:[%s2071_s26 + $0x10] sm:$0xff] %v154_v2  ;;  %v168_v9 = vld [vmem:[%s2066_s25 + $0x108] sm:$0xff]  ;;  %v170_v10 = vld [vmem:[%s2066_s25 + $0x110] sm:$0xff]  ;;  %v172_v11 = vld [vmem:[%s2066_s25 + $0x118] sm:$0xff] }
  0x13   : > { %157 = vst [vmem:[%s2071_s26 + $0x18] sm:$0xff] %v156_v3  ;;  %v174_v12 = vld [vmem:[%s2066_s25 + $0x120] sm:$0xff]  ;;  %v176_v13 = vld [vmem:[%s2066_s25 + $0x128] sm:$0xff]  ;;  %v178_v14 = vld [vmem:[%s2066_s25 + $0x130] sm:$0xff] }
  0x14   : > { %159 = vst [vmem:[%s2071_s26 + $0x20] sm:$0xff] %v158_v4  ;;  %v180_v15 = vld [vmem:[%s2066_s25 + $0x138] sm:$0xff]  ;;  %v182_v16 = vld [vmem:[%s2066_s25 + $0x200] sm:$0xff]  ;;  %v184_v17 = vld [vmem:[%s2066_s25 + $0x208] sm:$0xff] }
  0x15   : > { %161 = vst [vmem:[%s2071_s26 + $0x28] sm:$0xff] %v160_v5  ;;  %v186_v18 = vld [vmem:[%s2066_s25 + $0x210] sm:$0xff]  ;;  %v188_v19 = vld [vmem:[%s2066_s25 + $0x218] sm:$0xff]  ;;  %v190_v20 = vld [vmem:[%s2066_s25 + $0x220] sm:$0xff] }
  0x16   : > { %163 = vst [vmem:[%s2071_s26 + $0x30] sm:$0xff] %v162_v6  ;;  %v192_v21 = vld [vmem:[%s2066_s25 + $0x228] sm:$0xff]  ;;  %v194_v22 = vld [vmem:[%s2066_s25 + $0x230] sm:$0xff]  ;;  %v196_v23 = vld [vmem:[%s2066_s25 + $0x238] sm:$0xff] }
  0x17   : > { %165 = vst [vmem:[%s2071_s26 + $0x38] sm:$0xff] %v164_v7  ;;  %v198_v24 = vld [vmem:[%s2066_s25 + $0x300] sm:$0xff]  ;;  %v200_v25 = vld [vmem:[%s2066_s25 + $0x308] sm:$0xff]  ;;  %v202_v26 = vld [vmem:[%s2066_s25 + $0x310] sm:$0xff] }
  0x18   : > { %167 = vst [vmem:[%s2071_s26 + $0x40] sm:$0xff] %v166_v8  ;;  %v204_v27 = vld [vmem:[%s2066_s25 + $0x318] sm:$0xff]  ;;  %v206_v28 = vld [vmem:[%s2066_s25 + $0x320] sm:$0xff]  ;;  %v208_v29 = vld [vmem:[%s2066_s25 + $0x328] sm:$0xff] }
  0x19   : > { %169 = vst [vmem:[%s2071_s26 + $0x48] sm:$0xff] %v168_v9  ;;  %v210_v30 = vld [vmem:[%s2066_s25 + $0x330] sm:$0xff]  ;;  %v212_v31 = vld [vmem:[%s2066_s25 + $0x338] sm:$0xff]  ;;  %v214_v32 = vld [vmem:[%s2066_s25 + $0x400] sm:$0xff] }
  0x1a   : > { %171 = vst [vmem:[%s2071_s26 + $0x50] sm:$0xff] %v170_v10  ;;  %v216_v33 = vld [vmem:[%s2066_s25 + $0x408] sm:$0xff]  ;;  %v218_v34 = vld [vmem:[%s2066_s25 + $0x410] sm:$0xff]  ;;  %v220_v35 = vld [vmem:[%s2066_s25 + $0x418] sm:$0xff] }
  0x1b   : > { %173 = vst [vmem:[%s2071_s26 + $0x58] sm:$0xff] %v172_v11  ;;  %v222_v36 = vld [vmem:[%s2066_s25 + $0x420] sm:$0xff]  ;;  %v224_v37 = vld [vmem:[%s2066_s25 + $0x428] sm:$0xff]  ;;  %v226_v38 = vld [vmem:[%s2066_s25 + $0x430] sm:$0xff] }
  0x1c   : > { %175 = vst [vmem:[%s2071_s26 + $0x60] sm:$0xff] %v174_v12  ;;  %v228_v39 = vld [vmem:[%s2066_s25 + $0x438] sm:$0xff]  ;;  %v230_v40 = vld [vmem:[%s2066_s25 + $0x500] sm:$0xff]  ;;  %v232_v41 = vld [vmem:[%s2066_s25 + $0x508] sm:$0xff] }
  0x1d   : > { %177 = vst [vmem:[%s2071_s26 + $0x68] sm:$0xff] %v176_v13  ;;  %v234_v42 = vld [vmem:[%s2066_s25 + $0x510] sm:$0xff]  ;;  %v236_v43 = vld [vmem:[%s2066_s25 + $0x518] sm:$0xff]  ;;  %v238_v44 = vld [vmem:[%s2066_s25 + $0x520] sm:$0xff] }
  0x1e   : > { %179 = vst [vmem:[%s2071_s26 + $0x70] sm:$0xff] %v178_v14  ;;  %v240_v45 = vld [vmem:[%s2066_s25 + $0x528] sm:$0xff]  ;;  %v242_v46 = vld [vmem:[%s2066_s25 + $0x530] sm:$0xff]  ;;  %v244_v47 = vld [vmem:[%s2066_s25 + $0x538] sm:$0xff] }
  0x1f   : > { %181 = vst [vmem:[%s2071_s26 + $0x78] sm:$0xff] %v180_v15  ;;  %v246_v48 = vld [vmem:[%s2066_s25 + $0x600] sm:$0xff]  ;;  %v248_v49 = vld [vmem:[%s2066_s25 + $0x608] sm:$0xff]  ;;  %v250_v50 = vld [vmem:[%s2066_s25 + $0x610] sm:$0xff] }
  0x20   : > { %183 = vst [vmem:[%s2071_s26 + $0x80] sm:$0xff] %v182_v16  ;;  %v252_v51 = vld [vmem:[%s2066_s25 + $0x618] sm:$0xff]  ;;  %v254_v52 = vld [vmem:[%s2066_s25 + $0x620] sm:$0xff]  ;;  %v256_v53 = vld [vmem:[%s2066_s25 + $0x628] sm:$0xff] }
  0x21   : > { %185 = vst [vmem:[%s2071_s26 + $0x88] sm:$0xff] %v184_v17  ;;  %v258_v54 = vld [vmem:[%s2066_s25 + $0x630] sm:$0xff]  ;;  %v260_v55 = vld [vmem:[%s2066_s25 + $0x638] sm:$0xff]  ;;  %v262_v56 = vld [vmem:[%s2066_s25 + $0x700] sm:$0xff] }
  0x22   : > { %187 = vst [vmem:[%s2071_s26 + $0x90] sm:$0xff] %v186_v18  ;;  %v264_v57 = vld [vmem:[%s2066_s25 + $0x708] sm:$0xff]  ;;  %v266_v58 = vld [vmem:[%s2066_s25 + $0x710] sm:$0xff]  ;;  %v268_v59 = vld [vmem:[%s2066_s25 + $0x718] sm:$0xff] }
  0x23   : > { %189 = vst [vmem:[%s2071_s26 + $0x98] sm:$0xff] %v188_v19  ;;  %v270_v60 = vld [vmem:[%s2066_s25 + $0x720] sm:$0xff]  ;;  %v272_v61 = vld [vmem:[%s2066_s25 + $0x728] sm:$0xff]  ;;  %v274_v62 = vld [vmem:[%s2066_s25 + $0x730] sm:$0xff] }
  0x24   : > { %191 = vst [vmem:[%s2071_s26 + $0xa0] sm:$0xff] %v190_v20  ;;  %v276_v63 = vld [vmem:[%s2066_s25 + $0x738] sm:$0xff]  ;;  %v278_v0 = vld [vmem:[%s2066_s25 + $0x800] sm:$0xff]  ;;  %v280_v1 = vld [vmem:[%s2066_s25 + $0x808] sm:$0xff] }
  0x25   : > { %193 = vst [vmem:[%s2071_s26 + $0xa8] sm:$0xff] %v192_v21  ;;  %v282_v2 = vld [vmem:[%s2066_s25 + $0x810] sm:$0xff]  ;;  %v284_v3 = vld [vmem:[%s2066_s25 + $0x818] sm:$0xff]  ;;  %v286_v4 = vld [vmem:[%s2066_s25 + $0x820] sm:$0xff] }
  0x26   : > { %195 = vst [vmem:[%s2071_s26 + $0xb0] sm:$0xff] %v194_v22  ;;  %v288_v5 = vld [vmem:[%s2066_s25 + $0x828] sm:$0xff]  ;;  %v290_v6 = vld [vmem:[%s2066_s25 + $0x830] sm:$0xff]  ;;  %v292_v7 = vld [vmem:[%s2066_s25 + $0x838] sm:$0xff] }
  0x27   : > { %197 = vst [vmem:[%s2071_s26 + $0xb8] sm:$0xff] %v196_v23  ;;  %v294_v8 = vld [vmem:[%s2066_s25 + $0x900] sm:$0xff]  ;;  %v296_v9 = vld [vmem:[%s2066_s25 + $0x908] sm:$0xff]  ;;  %v298_v10 = vld [vmem:[%s2066_s25 + $0x910] sm:$0xff] }
  0x28   : > { %199 = vst [vmem:[%s2071_s26 + $0xc0] sm:$0xff] %v198_v24  ;;  %v300_v11 = vld [vmem:[%s2066_s25 + $0x918] sm:$0xff]  ;;  %v302_v12 = vld [vmem:[%s2066_s25 + $0x920] sm:$0xff]  ;;  %v304_v13 = vld [vmem:[%s2066_s25 + $0x928] sm:$0xff] }
  0x29   : > { %201 = vst [vmem:[%s2071_s26 + $0xc8] sm:$0xff] %v200_v25  ;;  %v306_v14 = vld [vmem:[%s2066_s25 + $0x930] sm:$0xff]  ;;  %v308_v15 = vld [vmem:[%s2066_s25 + $0x938] sm:$0xff]  ;;  %v310_v16 = vld [vmem:[%s2066_s25 + $0xa00] sm:$0xff] }
  0x2a   : > { %203 = vst [vmem:[%s2071_s26 + $0xd0] sm:$0xff] %v202_v26  ;;  %v312_v17 = vld [vmem:[%s2066_s25 + $0xa08] sm:$0xff]  ;;  %v314_v18 = vld [vmem:[%s2066_s25 + $0xa10] sm:$0xff]  ;;  %v316_v19 = vld [vmem:[%s2066_s25 + $0xa18] sm:$0xff] }
  0x2b   : > { %205 = vst [vmem:[%s2071_s26 + $0xd8] sm:$0xff] %v204_v27  ;;  %v318_v20 = vld [vmem:[%s2066_s25 + $0xa20] sm:$0xff]  ;;  %v320_v21 = vld [vmem:[%s2066_s25 + $0xa28] sm:$0xff]  ;;  %v322_v22 = vld [vmem:[%s2066_s25 + $0xa30] sm:$0xff] }
  0x2c   : > { %207 = vst [vmem:[%s2071_s26 + $0xe0] sm:$0xff] %v206_v28  ;;  %v324_v23 = vld [vmem:[%s2066_s25 + $0xa38] sm:$0xff]  ;;  %v326_v24 = vld [vmem:[%s2066_s25 + $0xb00] sm:$0xff]  ;;  %v328_v25 = vld [vmem:[%s2066_s25 + $0xb08] sm:$0xff] }
  0x2d   : > { %209 = vst [vmem:[%s2071_s26 + $0xe8] sm:$0xff] %v208_v29  ;;  %v330_v26 = vld [vmem:[%s2066_s25 + $0xb10] sm:$0xff]  ;;  %v332_v27 = vld [vmem:[%s2066_s25 + $0xb18] sm:$0xff]  ;;  %v334_v28 = vld [vmem:[%s2066_s25 + $0xb20] sm:$0xff] }
  0x2e   : > { %211 = vst [vmem:[%s2071_s26 + $0xf0] sm:$0xff] %v210_v30  ;;  %v336_v29 = vld [vmem:[%s2066_s25 + $0xb28] sm:$0xff]  ;;  %v338_v30 = vld [vmem:[%s2066_s25 + $0xb30] sm:$0xff] }
  0x2f   : > { %213 = vst [vmem:[%s2071_s26 + $0xf8] sm:$0xff] %v212_v31  ;;  %v340_v31 = vld [vmem:[%s2066_s25 + $0xb38] sm:$0xff] }
  0x30   : > { %215 = vst [vmem:[%s2071_s26 + $0x100] sm:$0xff] %v214_v32  ;;  %v342_v32 = vld [vmem:[%s2066_s25 + $0xc00] sm:$0xff] }
  0x31   : > { %217 = vst [vmem:[%s2071_s26 + $0x108] sm:$0xff] %v216_v33  ;;  %v344_v33 = vld [vmem:[%s2066_s25 + $0xc08] sm:$0xff] }
  0x32   : > { %219 = vst [vmem:[%s2071_s26 + $0x110] sm:$0xff] %v218_v34  ;;  %v346_v34 = vld [vmem:[%s2066_s25 + $0xc10] sm:$0xff] }
  0x33   : > { %221 = vst [vmem:[%s2071_s26 + $0x118] sm:$0xff] %v220_v35  ;;  %v348_v35 = vld [vmem:[%s2066_s25 + $0xc18] sm:$0xff] }
  0x34   : > { %223 = vst [vmem:[%s2071_s26 + $0x120] sm:$0xff] %v222_v36  ;;  %v350_v36 = vld [vmem:[%s2066_s25 + $0xc20] sm:$0xff] }
  0x35   : > { %225 = vst [vmem:[%s2071_s26 + $0x128] sm:$0xff] %v224_v37  ;;  %v352_v37 = vld [vmem:[%s2066_s25 + $0xc28] sm:$0xff] }
  0x36   : > { %227 = vst [vmem:[%s2071_s26 + $0x130] sm:$0xff] %v226_v38  ;;  %v354_v38 = vld [vmem:[%s2066_s25 + $0xc30] sm:$0xff] }
  0x37   : > { %229 = vst [vmem:[%s2071_s26 + $0x138] sm:$0xff] %v228_v39  ;;  %v356_v39 = vld [vmem:[%s2066_s25 + $0xc38] sm:$0xff] }
  0x38   : > { %231 = vst [vmem:[%s2071_s26 + $0x140] sm:$0xff] %v230_v40 }
  0x39   : > { %233 = vst [vmem:[%s2071_s26 + $0x148] sm:$0xff] %v232_v41 }
  0x3a   : > { %235 = vst [vmem:[%s2071_s26 + $0x150] sm:$0xff] %v234_v42 }
  0x3b   : > { %237 = vst [vmem:[%s2071_s26 + $0x158] sm:$0xff] %v236_v43 }
  0x3c   : > { %239 = vst [vmem:[%s2071_s26 + $0x160] sm:$0xff] %v238_v44 }
  0x3d   : > { %241 = vst [vmem:[%s2071_s26 + $0x168] sm:$0xff] %v240_v45 }
  0x3e   : > { %243 = vst [vmem:[%s2071_s26 + $0x170] sm:$0xff] %v242_v46 }
  0x3f   : > { %245 = vst [vmem:[%s2071_s26 + $0x178] sm:$0xff] %v244_v47 }
  0x40   : > { %247 = vst [vmem:[%s2071_s26 + $0x180] sm:$0xff] %v246_v48 }
  0x41   : > { %249 = vst [vmem:[%s2071_s26 + $0x188] sm:$0xff] %v248_v49 }
  0x42   : > { %251 = vst [vmem:[%s2071_s26 + $0x190] sm:$0xff] %v250_v50 }
  0x43   : > { %253 = vst [vmem:[%s2071_s26 + $0x198] sm:$0xff] %v252_v51 }
  0x44   : > { %255 = vst [vmem:[%s2071_s26 + $0x1a0] sm:$0xff] %v254_v52 }
  0x45   : > { %257 = vst [vmem:[%s2071_s26 + $0x1a8] sm:$0xff] %v256_v53 }
  0x46   : > { %259 = vst [vmem:[%s2071_s26 + $0x1b0] sm:$0xff] %v258_v54 }
  0x47   : > { %261 = vst [vmem:[%s2071_s26 + $0x1b8] sm:$0xff] %v260_v55 }
  0x48   : > { %263 = vst [vmem:[%s2071_s26 + $0x1c0] sm:$0xff] %v262_v56 }
  0x49   : > { %265 = vst [vmem:[%s2071_s26 + $0x1c8] sm:$0xff] %v264_v57 }
  0x4a   : > { %267 = vst [vmem:[%s2071_s26 + $0x1d0] sm:$0xff] %v266_v58 }
  0x4b   : > { %269 = vst [vmem:[%s2071_s26 + $0x1d8] sm:$0xff] %v268_v59 }
  0x4c   : > { %271 = vst [vmem:[%s2071_s26 + $0x1e0] sm:$0xff] %v270_v60 }
  0x4d   : > { %273 = vst [vmem:[%s2071_s26 + $0x1e8] sm:$0xff] %v272_v61 }
  0x4e   : > { %275 = vst [vmem:[%s2071_s26 + $0x1f0] sm:$0xff] %v274_v62 }
  0x4f   : > { %277 = vst [vmem:[%s2071_s26 + $0x1f8] sm:$0xff] %v276_v63 }
  0x50   : > { %279 = vst [vmem:[%s2071_s26 + $0x200] sm:$0xff] %v278_v0 }
  0x51   : > { %281 = vst [vmem:[%s2071_s26 + $0x208] sm:$0xff] %v280_v1 }
  0x52   : > { %283 = vst [vmem:[%s2071_s26 + $0x210] sm:$0xff] %v282_v2 }
  0x53   : > { %285 = vst [vmem:[%s2071_s26 + $0x218] sm:$0xff] %v284_v3 }
  0x54   : > { %287 = vst [vmem:[%s2071_s26 + $0x220] sm:$0xff] %v286_v4 }
  0x55   : > { %289 = vst [vmem:[%s2071_s26 + $0x228] sm:$0xff] %v288_v5 }
  0x56   : > { %291 = vst [vmem:[%s2071_s26 + $0x230] sm:$0xff] %v290_v6 }
  0x57   : > { %293 = vst [vmem:[%s2071_s26 + $0x238] sm:$0xff] %v292_v7 }
  0x58   : > { %295 = vst [vmem:[%s2071_s26 + $0x240] sm:$0xff] %v294_v8 }
  0x59   : > { %297 = vst [vmem:[%s2071_s26 + $0x248] sm:$0xff] %v296_v9 }
  0x5a   : > { %299 = vst [vmem:[%s2071_s26 + $0x250] sm:$0xff] %v298_v10 }
  0x5b   : > { %301 = vst [vmem:[%s2071_s26 + $0x258] sm:$0xff] %v300_v11 }
  0x5c   : > { %303 = vst [vmem:[%s2071_s26 + $0x260] sm:$0xff] %v302_v12 }
  0x5d   : > { %305 = vst [vmem:[%s2071_s26 + $0x268] sm:$0xff] %v304_v13 }
  0x5e   : > { %307 = vst [vmem:[%s2071_s26 + $0x270] sm:$0xff] %v306_v14 }
  0x5f   : > { %309 = vst [vmem:[%s2071_s26 + $0x278] sm:$0xff] %v308_v15 }
  0x60   : > { %311 = vst [vmem:[%s2071_s26 + $0x280] sm:$0xff] %v310_v16 }
  0x61   : > { %313 = vst [vmem:[%s2071_s26 + $0x288] sm:$0xff] %v312_v17 }
  0x62   : > { %315 = vst [vmem:[%s2071_s26 + $0x290] sm:$0xff] %v314_v18 }
  0x63   : > { %317 = vst [vmem:[%s2071_s26 + $0x298] sm:$0xff] %v316_v19 }
  0x64   : > { %319 = vst [vmem:[%s2071_s26 + $0x2a0] sm:$0xff] %v318_v20 }
  0x65   : > { %321 = vst [vmem:[%s2071_s26 + $0x2a8] sm:$0xff] %v320_v21 }
  0x66   : > { %323 = vst [vmem:[%s2071_s26 + $0x2b0] sm:$0xff] %v322_v22 }
  0x67   : > { %325 = vst [vmem:[%s2071_s26 + $0x2b8] sm:$0xff] %v324_v23 }
  0x68   : > { %327 = vst [vmem:[%s2071_s26 + $0x2c0] sm:$0xff] %v326_v24 }
  0x69   : > { %329 = vst [vmem:[%s2071_s26 + $0x2c8] sm:$0xff] %v328_v25 }
  0x6a   : > { %331 = vst [vmem:[%s2071_s26 + $0x2d0] sm:$0xff] %v330_v26 }
  0x6b   : > { %333 = vst [vmem:[%s2071_s26 + $0x2d8] sm:$0xff] %v332_v27 }
  0x6c   : > { %335 = vst [vmem:[%s2071_s26 + $0x2e0] sm:$0xff] %v334_v28 }
  0x6d   : > { %337 = vst [vmem:[%s2071_s26 + $0x2e8] sm:$0xff] %v336_v29 }
  0x6e   : > { %339 = vst [vmem:[%s2071_s26 + $0x2f0] sm:$0xff] %v338_v30 }
  0x6f   : > { %341 = vst [vmem:[%s2071_s26 + $0x2f8] sm:$0xff] %v340_v31 }
  0x70   : > { %343 = vst [vmem:[%s2071_s26 + $0x300] sm:$0xff] %v342_v32 }
  0x71   : > { %345 = vst [vmem:[%s2071_s26 + $0x308] sm:$0xff] %v344_v33 }
  0x72   : > { %347 = vst [vmem:[%s2071_s26 + $0x310] sm:$0xff] %v346_v34 }
  0x73   : > { %349 = vst [vmem:[%s2071_s26 + $0x318] sm:$0xff] %v348_v35 }
  0x74   : > { %351 = vst [vmem:[%s2071_s26 + $0x320] sm:$0xff] %v350_v36 }
  0x75   : > { %353 = vst [vmem:[%s2071_s26 + $0x328] sm:$0xff] %v352_v37 }
  0x76   : > { %355 = vst [vmem:[%s2071_s26 + $0x330] sm:$0xff] %v354_v38 }
  0x77   : > { %357 = vst [vmem:[%s2071_s26 + $0x338] sm:$0xff] %v356_v39 }
  0x78 PF: > { %p1425_p5 = scmp.ge.s32.totalorder %s2009_s14, 1  ;;  %p362_p6 = scmp.lt.s32.totalorder %s2009_s14, 5 }
  0x7a   : > { %p363_p7 = pnand %p1425_p5, %p362_p6 }
  0x7b   : > { %s369_s27 = sand.u32 (!%p363_p7), 1, %s2001_s12   ;;  %s1426_s7 = sshll.u32 (!%p363_p7), %s1419_s15, 4 }
  0x7c   : > { %366 = sbr.rel (%p363_p7) target bundleno = 392 (0x188), region = 51  ;;  %p394_p8 = scmp.lt.s32.totalorder (!%p363_p7), %s1426_s7, 63 }
  0x7d   : > { %s1928_s28 = smul.u32 (!%p363_p7), 832, %s369_s27 }
  0x7f   : > { %s2281_s29 = scalar_lea.vmem (!%p363_p7), [#allocation2], %s1928_s28 }
  0x81   : > { %v497_v40 = vld [vmem:[%s2281_s29 + $0x300] sm:$0x11]  ;;  %v498_v41 = vld [vmem:[%s2281_s29 + $0x308] sm:$0x11]  ;;  %vm1035_vm0 = vcmask 1040384   ;;  %vm1031_vm1 = vcmask 801792  }
  0x82   : > { %v807_v42 = vunpack.c.l.b16 %v497_v40  ;;  %v808_v43 = vunpack.c.h.b16 %v497_v40  ;;  %v809_v44 = vunpack.c.l.b16 %v498_v41  ;;  %v810_v45 = vunpack.c.h.b16 %v498_v41  ;;  %v1750_v46 = vld [vmem:[%s2281_s29 + $0x280] sm:$0xf]  ;;  %v1911_v52 = vld [vmem:[%s2281_s29 + $0x284] sm:$0xf]  ;;  %v1758_v54 = vld [vmem:[%s2281_s29 + $0x288] sm:$0xf] }
  0x83   : > { %v1919_v47 = vld [vmem:[%s2281_s29 + $0x2bc] sm:$0xf0]  ;;  %v1752_v53 = vld [vmem:[%s2281_s29 + $0x2c0] sm:$0xf0]  ;;  %v1920_v55 = vld [vmem:[%s2281_s29 + $0x2c4] sm:$0xf0] }
  0x84   : > { %v919_v48 = vpack.c.b16 %v807_v42, %v807_v42  ;;  %v920_v49 = vpack.c.b16 %v808_v43, %v808_v43  ;;  %v921_v50 = vpack.c.b16 %v809_v44, %v809_v44  ;;  %v922_v51 = vpack.c.b16 %v810_v45, %v810_v45  ;;  %v1912_v56 = vld [vmem:[%s2281_s29 + $0x28c] sm:$0xf]  ;;  %v1686_v0 = vld [vmem:[%s2281_s29 + $0x200] sm:$0xf]  ;;  %v1895_v4 = vld [vmem:[%s2281_s29 + $0x204] sm:$0xf] }
  0x85   : > { %v1760_v57 = vld [vmem:[%s2281_s29 + $0x2c8] sm:$0xf0]  ;;  %v1751_v62 = vor.u32 %v1919_v47, %v1750_v46  ;;  %v1755_v63 = vor.u32 %v1911_v52, %v1752_v53  ;;  %v1903_v1 = vld [vmem:[%s2281_s29 + $0x23c] sm:$0xf0]  ;;  %v1759_v2 = vor.u32 %v1920_v55, %v1758_v54  ;;  %v1688_v5 = vld [vmem:[%s2281_s29 + $0x240] sm:$0xf0] }
  0x86   : > { %v1037_v58 = vsel %vm1035_vm0, %v919_v48, 0  ;;  %v1040_v59 = vsel %vm1035_vm0, %v920_v49, 0  ;;  %v1043_v60 = vsel %vm1035_vm0, %v921_v50, 0  ;;  %v1046_v61 = vsel %vm1035_vm0, %v922_v51, 0  ;;  %v1694_v6 = vld [vmem:[%s2281_s29 + $0x208] sm:$0xf] }
  0x87   : > { %1085 = vmatpush.bf16.msra.mxu0 %v1037_v58  ;;  %1098 = vmatpush.bf16.msra.mxu1 %v1040_v59  ;;  %v1763_v3 = vor.u32 %v1912_v56, %v1760_v57  ;;  %v1904_v7 = vld [vmem:[%s2281_s29 + $0x244] sm:$0xf0]  ;;  %v1896_v8 = vld [vmem:[%s2281_s29 + $0x20c] sm:$0xf]  ;;  %v1687_v10 = vor.u32 %v1903_v1, %v1686_v0  ;;  %v1691_v11 = vor.u32 %v1895_v4, %v1688_v5  ;;  %v1622_v12 = vld [vmem:[%s2281_s29 + $0x180] sm:$0xf] }
  0x88   : > { %1111 = vmatpush.bf16.msra.mxu2 %v1043_v60  ;;  %1124 = vmatpush.bf16.msra.mxu3 %v1046_v61  ;;  %v1696_v9 = vld [vmem:[%s2281_s29 + $0x248] sm:$0xf0]  ;;  %v1887_v13 = vld [vmem:[%s2281_s29 + $0x1bc] sm:$0xf0]  ;;  %v1695_v14 = vor.u32 %v1904_v7, %v1694_v6  ;;  %v1879_v16 = vld [vmem:[%s2281_s29 + $0x184] sm:$0xf] }
  0x89   : > { %v1699_v15 = vor.u32 %v1896_v8, %v1696_v9  ;;  %v1624_v17 = vld [vmem:[%s2281_s29 + $0x1c0] sm:$0xf0]  ;;  %v1630_v18 = vld [vmem:[%s2281_s29 + $0x188] sm:$0xf]  ;;  %v1880_v20 = vld [vmem:[%s2281_s29 + $0x18c] sm:$0xf]  ;;  %v1623_v22 = vor.u32 %v1887_v13, %v1622_v12 }
  0x8a   : > { %v1888_v19 = vld [vmem:[%s2281_s29 + $0x1c4] sm:$0xf0]  ;;  %v1632_v21 = vld [vmem:[%s2281_s29 + $0x1c8] sm:$0xf0]  ;;  %v1627_v23 = vor.u32 %v1879_v16, %v1624_v17  ;;  %v1558_v24 = vld [vmem:[%s2281_s29 + $0x100] sm:$0xf] }
  0x8b   : > { %1086 = vmatpush.bf16.msra.mxu0 %v1751_v62  ;;  %1099 = vmatpush.bf16.msra.mxu1 %v1755_v63  ;;  %v1871_v25 = vld [vmem:[%s2281_s29 + $0x13c] sm:$0xf0]  ;;  %v1631_v26 = vor.u32 %v1888_v19, %v1630_v18  ;;  %v1635_v27 = vor.u32 %v1880_v20, %v1632_v21  ;;  %v1863_v28 = vld [vmem:[%s2281_s29 + $0x104] sm:$0xf]  ;;  %v1566_v30 = vld [vmem:[%s2281_s29 + $0x108] sm:$0xf] }
  0x8c   : > { %1112 = vmatpush.bf16.msra.mxu2 %v1759_v2  ;;  %1125 = vmatpush.bf16.msra.mxu3 %v1763_v3  ;;  %v1560_v29 = vld [vmem:[%s2281_s29 + $0x140] sm:$0xf0]  ;;  %v1872_v31 = vld [vmem:[%s2281_s29 + $0x144] sm:$0xf0]  ;;  %v1864_v32 = vld [vmem:[%s2281_s29 + $0x10c] sm:$0xf]  ;;  %v1559_v35 = vor.u32 %v1871_v25, %v1558_v24 }
  0x8d   : > { %v1568_v33 = vld [vmem:[%s2281_s29 + $0x148] sm:$0xf0]  ;;  %v1494_v34 = vld [vmem:[%s2281_s29 + $0x80] sm:$0xf]  ;;  %v1563_v36 = vor.u32 %v1863_v28, %v1560_v29  ;;  %v1847_v38 = vld [vmem:[%s2281_s29 + $0x84] sm:$0xf]  ;;  %v1567_v40 = vor.u32 %v1872_v31, %v1566_v30 }
  0x8e   : > { %v1855_v37 = vld [vmem:[%s2281_s29 + $0xbc] sm:$0xf0]  ;;  %v499_v39 = vld [vmem:[%s2281_s29 + $0x310] sm:$0x11]  ;;  %v1571_v41 = vor.u32 %v1864_v32, %v1568_v33  ;;  %v1496_v42 = vld [vmem:[%s2281_s29 + $0xc0] sm:$0xf0] }
  0x8f   : > { %1087 = vmatpush.bf16.msra.mxu0 %v1687_v10  ;;  %1100 = vmatpush.bf16.msra.mxu1 %v1691_v11  ;;  %v1502_v43 = vld [vmem:[%s2281_s29 + $0x88] sm:$0xf]  ;;  %v500_v44 = vld [vmem:[%s2281_s29 + $0x318] sm:$0x11]  ;;  %v1848_v46 = vld [vmem:[%s2281_s29 + $0x8c] sm:$0xf]  ;;  %v811_v48 = vunpack.c.l.b16 %v499_v39  ;;  %v812_v49 = vunpack.c.h.b16 %v499_v39  ;;  %v1495_v50 = vor.u32 %v1855_v37, %v1494_v34  ;;  %v1499_v51 = vor.u32 %v1847_v38, %v1496_v42 }
  0x90   : > { %1113 = vmatpush.bf16.msra.mxu2 %v1695_v14  ;;  %1126 = vmatpush.bf16.msra.mxu3 %v1699_v15  ;;  %v1856_v45 = vld [vmem:[%s2281_s29 + $0xc4] sm:$0xf0]  ;;  %v1504_v47 = vld [vmem:[%s2281_s29 + $0xc8] sm:$0xf0]  ;;  %v1430_v52 = vld [vmem:[%s2281_s29] sm:$0xf]  ;;  %v813_v54 = vunpack.c.l.b16 %v500_v44  ;;  %v814_v55 = vunpack.c.h.b16 %v500_v44 }
  0x91   : > { %v1839_v53 = vld [vmem:[%s2281_s29 + $0x3c] sm:$0xf0]  ;;  %v1503_v56 = vor.u32 %v1856_v45, %v1502_v43  ;;  %v1507_v57 = vor.u32 %v1848_v46, %v1504_v47  ;;  %v1831_v58 = vld [vmem:[%s2281_s29 + $0x4] sm:$0xf]  ;;  %v1438_v60 = vld [vmem:[%s2281_s29 + $0x8] sm:$0xf]  ;;  %v923_v1 = vpack.c.b16 %v811_v48, %v811_v48  ;;  %v924_v2 = vpack.c.b16 %v812_v49, %v812_v49 }
  0x92   : > { %v1432_v59 = vld [vmem:[%s2281_s29 + $0x40] sm:$0xf0]  ;;  %v1840_v61 = vld [vmem:[%s2281_s29 + $0x44] sm:$0xf0]  ;;  %v1832_v62 = vld [vmem:[%s2281_s29 + $0xc] sm:$0xf]  ;;  %v1431_v0 = vor.u32 %v1839_v53, %v1430_v52  ;;  %v925_v4 = vpack.c.b16 %v813_v54, %v813_v54  ;;  %v926_v5 = vpack.c.b16 %v814_v55, %v814_v55 }
  0x93   : > { %1088 = vmatpush.bf16.msra.mxu0 %v1623_v22  ;;  %1101 = vmatpush.bf16.msra.mxu1 %v1627_v23  ;;  %v1440_v63 = vld [vmem:[%s2281_s29 + $0x48] sm:$0xf0]  ;;  %v1435_v3 = vor.u32 %v1831_v58, %v1432_v59  ;;  %v1439_v6 = vor.u32 %v1840_v61, %v1438_v60  ;;  %v1766_v8 = vld [vmem:[%s2281_s29 + $0x290] sm:$0xf]  ;;  %v1913_v10 = vld [vmem:[%s2281_s29 + $0x294] sm:$0xf] }
  0x94   : > { %1114 = vmatpush.bf16.msra.mxu2 %v1631_v26  ;;  %1127 = vmatpush.bf16.msra.mxu3 %v1635_v27  ;;  %v1443_v7 = vor.u32 %v1832_v62, %v1440_v63  ;;  %v1921_v9 = vld [vmem:[%s2281_s29 + $0x2cc] sm:$0xf0]  ;;  %v1768_v11 = vld [vmem:[%s2281_s29 + $0x2d0] sm:$0xf0]  ;;  %v1049_v12 = vsel %vm1035_vm0, %v923_v1, 0  ;;  %v1052_v13 = vsel %vm1035_vm0, %v924_v2, 0 }
  0x95   : > { %v1774_v14 = vld [vmem:[%s2281_s29 + $0x298] sm:$0xf]  ;;  %v1055_v16 = vsel %vm1035_vm0, %v925_v4, 0  ;;  %v1058_v17 = vsel %vm1035_vm0, %v926_v5, 0  ;;  %v1914_v18 = vld [vmem:[%s2281_s29 + $0x29c] sm:$0xf]  ;;  %v1767_v21 = vor.u32 %v1921_v9, %v1766_v8  ;;  %v1771_v22 = vor.u32 %v1913_v10, %v1768_v11 }
  0x96   : > { %v1922_v15 = vld [vmem:[%s2281_s29 + $0x2d4] sm:$0xf0]  ;;  %v1776_v19 = vld [vmem:[%s2281_s29 + $0x2d8] sm:$0xf0]  ;;  %v2354_v20 = vld [vmem:[%s2591_s1] sm:$0x3] }
  0x97   : > { %1089 = vmatpush.bf16.msra.mxu0 %v1559_v35  ;;  %1102 = vmatpush.bf16.msra.mxu1 %v1563_v36  ;;  %v1702_v23 = vld [vmem:[%s2281_s29 + $0x210] sm:$0xf]  ;;  %v1775_v25 = vor.u32 %v1922_v15, %v1774_v14  ;;  %v1779_v26 = vor.u32 %v1914_v18, %v1776_v19  ;;  %v1897_v27 = vld [vmem:[%s2281_s29 + $0x214] sm:$0xf]  ;;  %v1710_v29 = vld [vmem:[%s2281_s29 + $0x218] sm:$0xf] }
  0x98   : > { %1115 = vmatpush.bf16.msra.mxu2 %v1567_v40  ;;  %1128 = vmatpush.bf16.msra.mxu3 %v1571_v41  ;;  %v1905_v24 = vld [vmem:[%s2281_s29 + $0x24c] sm:$0xf0]  ;;  %v1704_v28 = vld [vmem:[%s2281_s29 + $0x250] sm:$0xf0]  ;;  %v1906_v30 = vld [vmem:[%s2281_s29 + $0x254] sm:$0xf0] }
  0x99   : > { %v1898_v31 = vld [vmem:[%s2281_s29 + $0x21c] sm:$0xf]  ;;  %v1703_v33 = vor.u32 %v1905_v24, %v1702_v23  ;;  %v1707_v34 = vor.u32 %v1897_v27, %v1704_v28  ;;  %v1638_v35 = vld [vmem:[%s2281_s29 + $0x190] sm:$0xf]  ;;  %v1711_v37 = vor.u32 %v1906_v30, %v1710_v29  ;;  %v1881_v39 = vld [vmem:[%s2281_s29 + $0x194] sm:$0xf] }
  0x9a   : > { %v1712_v32 = vld [vmem:[%s2281_s29 + $0x258] sm:$0xf0]  ;;  %v1889_v36 = vld [vmem:[%s2281_s29 + $0x1cc] sm:$0xf0]  ;;  %v1640_v40 = vld [vmem:[%s2281_s29 + $0x1d0] sm:$0xf0] }
  0x9b   : > { %1090 = vmatpush.bf16.msra.mxu0 %v1495_v50  ;;  %1103 = vmatpush.bf16.msra.mxu1 %v1499_v51  ;;  %v1715_v38 = vor.u32 %v1898_v31, %v1712_v32  ;;  %v1646_v41 = vld [vmem:[%s2281_s29 + $0x198] sm:$0xf]  ;;  %v1882_v43 = vld [vmem:[%s2281_s29 + $0x19c] sm:$0xf]  ;;  %v1639_v45 = vor.u32 %v1889_v36, %v1638_v35  ;;  %v1643_v46 = vor.u32 %v1881_v39, %v1640_v40  ;;  %v1574_v47 = vld [vmem:[%s2281_s29 + $0x110] sm:$0xf] }
  0x9c   : > { %1116 = vmatpush.bf16.msra.mxu2 %v1503_v56  ;;  %1129 = vmatpush.bf16.msra.mxu3 %v1507_v57  ;;  %v1890_v42 = vld [vmem:[%s2281_s29 + $0x1d4] sm:$0xf0]  ;;  %v1648_v44 = vld [vmem:[%s2281_s29 + $0x1d8] sm:$0xf0]  ;;  %v1873_v48 = vld [vmem:[%s2281_s29 + $0x14c] sm:$0xf0] }
  0x9d   : > { %v1865_v49 = vld [vmem:[%s2281_s29 + $0x114] sm:$0xf]  ;;  %v1647_v50 = vor.u32 %v1890_v42, %v1646_v41  ;;  %v1651_v51 = vor.u32 %v1882_v43, %v1648_v44  ;;  %v1582_v53 = vld [vmem:[%s2281_s29 + $0x118] sm:$0xf]  ;;  %v1866_v55 = vld [vmem:[%s2281_s29 + $0x11c] sm:$0xf]  ;;  %v1575_v59 = vor.u32 %v1873_v48, %v1574_v47 }
  0x9e   : > { %v1576_v52 = vld [vmem:[%s2281_s29 + $0x150] sm:$0xf0]  ;;  %v1874_v54 = vld [vmem:[%s2281_s29 + $0x154] sm:$0xf0]  ;;  %v1584_v56 = vld [vmem:[%s2281_s29 + $0x158] sm:$0xf0] }
  0x9f   : > { %1091 = vmatpush.bf16.msra.mxu0 %v1431_v0  ;;  %1104 = vmatpush.bf16.msra.mxu1 %v1435_v3  ;;  %v2011_v57 = vmov 0   ;;  %v1510_v58 = vld [vmem:[%s2281_s29 + $0x90] sm:$0xf]  ;;  %v1579_v60 = vor.u32 %v1865_v49, %v1576_v52  ;;  %v1849_v62 = vld [vmem:[%s2281_s29 + $0x94] sm:$0xf]  ;;  %v1583_v0 = vor.u32 %v1874_v54, %v1582_v53  ;;  %v1587_v1 = vor.u32 %v1866_v55, %v1584_v56  ;;  %s2598_s7 = smov (!%p394_p8, %s1426_s7), 63 }
  0xa0   : > { %1117 = vmatpush.bf16.msra.mxu2 %v1439_v6  ;;  %1130 = vmatpush.bf16.msra.mxu3 %v1443_v7  ;;  %v1857_v61 = vld [vmem:[%s2281_s29 + $0xcc] sm:$0xf0]  ;;  %v501_v63 = vld [vmem:[%s2281_s29 + $0x320] sm:$0x11]  ;;  %v1512_v2 = vld [vmem:[%s2281_s29 + $0xd0] sm:$0xf0] }
  0xa1   : > { %1954 = vset.pattern.permute.xlu0 %v2011_v57  ;;  %v1518_v3 = vld [vmem:[%s2281_s29 + $0x98] sm:$0xf]  ;;  %v502_v4 = vld [vmem:[%s2281_s29 + $0x328] sm:$0x11]  ;;  %v1850_v6 = vld [vmem:[%s2281_s29 + $0x9c] sm:$0xf]  ;;  %v815_v8 = vunpack.c.l.b16 %v501_v63  ;;  %v816_v9 = vunpack.c.h.b16 %v501_v63  ;;  %v1511_v11 = vor.u32 %v1857_v61, %v1510_v58 }
  0xa2   : > { %1813 = vmatmul.msk.bf16.vlgmr.msra.gmra.mxu1 %vm1031_vm1, %v2354_v20  ;;  %1812 = vmatmul.msk.bf16.vlgmr.msra.gmra.mxu0 %vm1031_vm1, %v2354_v20  ;;  %v1858_v5 = vld [vmem:[%s2281_s29 + $0xd4] sm:$0xf0]  ;;  %v1520_v7 = vld [vmem:[%s2281_s29 + $0xd8] sm:$0xf0]  ;;  %v505_v10 = vld [vmem:[%s2592_s2] sm:$0x7]  ;;  %v817_v15 = vunpack.c.l.b16 %v502_v4 }
  0xa3   : > { %1137 = vmatpush.bf16.msrb.mxu0 %v1049_v12  ;;  %1150 = vmatpush.bf16.msrb.mxu1 %v1052_v13  ;;  %v1515_v12 = vor.u32 %v1849_v62, %v1512_v2  ;;  %v1446_v13 = vld [vmem:[%s2281_s29 + $0x10] sm:$0xf]  ;;  %v1523_v18 = vor.u32 %v1850_v6, %v1520_v7  ;;  %v1833_v19 = vld [vmem:[%s2281_s29 + $0x14] sm:$0xf]  ;;  %v1842_v23 = vld [vmem:[%s2281_s29 + $0x54] sm:$0xf0]  ;;  %v927_v27 = vpack.c.b16 %v815_v8, %v815_v8 }
  0xa4   : > { %1163 = vmatpush.bf16.msrb.mxu2 %v1055_v16  ;;  %1176 = vmatpush.bf16.msrb.mxu3 %v1058_v17  ;;  %v1841_v14 = vld [vmem:[%s2281_s29 + $0x4c] sm:$0xf0]  ;;  %v818_v16 = vunpack.c.h.b16 %v502_v4  ;;  %v1519_v17 = vor.u32 %v1858_v5, %v1518_v3  ;;  %v1834_v24 = vld [vmem:[%s2281_s29 + $0x1c] sm:$0xf]  ;;  %v928_v28 = vpack.c.b16 %v816_v9, %v816_v9  ;;  %v929_v30 = vpack.c.b16 %v817_v15, %v817_v15  ;;  %v1923_v35 = vld [vmem:[%s2281_s29 + $0x2dc] sm:$0xf0] }
  0xa5   : > { %1815 = vmatmul.msk.bf16.vlgmr.msra.gmra.mxu3 %vm1031_vm1, %v2354_v20  ;;  %1814 = vmatmul.msk.bf16.vlgmr.msra.gmra.mxu2 %vm1031_vm1, %v2354_v20  ;;  %v1915_v36 = vld [vmem:[%s2281_s29 + $0x2a4] sm:$0xf]  ;;  %v1790_v40 = vld [vmem:[%s2281_s29 + $0x2a8] sm:$0xf]  ;;  %v1916_v44 = vld [vmem:[%s2281_s29 + $0x2ac] sm:$0xf] }
  0xa6   : > { %508 = vperm.xlu0 %1954, %v505_v10   ;;  %v930_v31 = vpack.c.b16 %v818_v16, %v818_v16  ;;  %v1064_v39 = vsel %vm1035_vm0, %v928_v28, 0  ;;  %v1924_v41 = vld [vmem:[%s2281_s29 + $0x2e4] sm:$0xf0]  ;;  %v1067_v42 = vsel %vm1035_vm0, %v929_v30, 0  ;;  %v1718_v48 = vld [vmem:[%s2281_s29 + $0x220] sm:$0xf] }
  0xa7   : > { %1138 = vmatpush.bf16.msrb.mxu0 %v1767_v21  ;;  %1151 = vmatpush.bf16.msrb.mxu1 %v1771_v22  ;;  %v1448_v21 = vld [vmem:[%s2281_s29 + $0x50] sm:$0xf0]  ;;  %v1454_v22 = vld [vmem:[%s2281_s29 + $0x18] sm:$0xf]  ;;  %v1907_v49 = vld [vmem:[%s2281_s29 + $0x25c] sm:$0xf0] }
  0xa8   : > { %1164 = vmatpush.bf16.msrb.mxu2 %v1775_v25  ;;  %1177 = vmatpush.bf16.msrb.mxu3 %v1779_v26  ;;  %v1456_v25 = vld [vmem:[%s2281_s29 + $0x58] sm:$0xf0]  ;;  %v1447_v26 = vor.u32 %v1841_v14, %v1446_v13  ;;  %v1451_v29 = vor.u32 %v1833_v19, %v1448_v21  ;;  %v1455_v32 = vor.u32 %v1842_v23, %v1454_v22  ;;  %v1070_v43 = vsel %vm1035_vm0, %v930_v31, 0  ;;  %v1899_v52 = vld [vmem:[%s2281_s29 + $0x224] sm:$0xf]  ;;  %s1427_s8 = sshll.u32 %s2598_s7, 2 }
  0xa9   : > { %v1720_v53 = vld [vmem:[%s2281_s29 + $0x260] sm:$0xf0]  ;;  %v1726_v54 = vld [vmem:[%s2281_s29 + $0x228] sm:$0xf]  ;;  %v1900_v56 = vld [vmem:[%s2281_s29 + $0x22c] sm:$0xf]  ;;  %v1719_v58 = vor.u32 %v1907_v49, %v1718_v48  ;;  %s2550_s11 = scalar_lea.vmem %s2593_s3, %s1427_s8 }
  0xaa   : > { %v1908_v55 = vld [vmem:[%s2281_s29 + $0x264] sm:$0xf0]  ;;  %v1728_v57 = vld [vmem:[%s2281_s29 + $0x268] sm:$0xf0]  ;;  %v1891_v61 = vld [vmem:[%s2281_s29 + $0x1dc] sm:$0xf0] }
  0xab   : > { %1139 = vmatpush.bf16.msrb.mxu0 %v1703_v33  ;;  %1152 = vmatpush.bf16.msrb.mxu1 %v1707_v34  ;;  %v1459_v33 = vor.u32 %v1834_v24, %v1456_v25  ;;  %v1782_v34 = vld [vmem:[%s2281_s29 + $0x2a0] sm:$0xf]  ;;  %v1727_v62 = vor.u32 %v1908_v55, %v1726_v54  ;;  %v1731_v63 = vor.u32 %v1900_v56, %v1728_v57  ;;  %v1662_v2 = vld [vmem:[%s2281_s29 + $0x1a8] sm:$0xf]  ;;  %v1884_v4 = vld [vmem:[%s2281_s29 + $0x1ac] sm:$0xf] }
  0xac   : > { %1165 = vmatpush.bf16.msrb.mxu2 %v1711_v37  ;;  %1178 = vmatpush.bf16.msrb.mxu3 %v1715_v38  ;;  %v1784_v37 = vld [vmem:[%s2281_s29 + $0x2e0] sm:$0xf0]  ;;  %v1061_v38 = vsel %vm1035_vm0, %v927_v27, 0  ;;  %v1892_v3 = vld [vmem:[%s2281_s29 + $0x1e4] sm:$0xf0]  ;;  %vm1332_vm2 = vcmask 1043456  }
  0xad   : > { %v1787_v47 = vor.u32 %v1915_v36, %v1784_v37  ;;  %v1664_v5 = vld [vmem:[%s2281_s29 + $0x1e8] sm:$0xf0]  ;;  %v1590_v8 = vld [vmem:[%s2281_s29 + $0x120] sm:$0xf]  ;;  %v1663_v10 = vor.u32 %v1892_v3, %v1662_v2  ;;  %v1592_v13 = vld [vmem:[%s2281_s29 + $0x160] sm:$0xf0] }
  0xae   : > { %v1875_v9 = vld [vmem:[%s2281_s29 + $0x15c] sm:$0xf0]  ;;  %v1598_v14 = vld [vmem:[%s2281_s29 + $0x128] sm:$0xf]  ;;  %v1868_v16 = vld [vmem:[%s2281_s29 + $0x12c] sm:$0xf] }
  0xaf   : > { %1140 = vmatpush.bf16.msrb.mxu0 %v1639_v45  ;;  %1153 = vmatpush.bf16.msrb.mxu1 %v1643_v46  ;;  %v1792_v45 = vld [vmem:[%s2281_s29 + $0x2e8] sm:$0xf0]  ;;  %v1783_v46 = vor.u32 %v1923_v35, %v1782_v34  ;;  %v1876_v15 = vld [vmem:[%s2281_s29 + $0x164] sm:$0xf0]  ;;  %v1591_v19 = vor.u32 %v1875_v9, %v1590_v8  ;;  %v1859_v22 = vld [vmem:[%s2281_s29 + $0xdc] sm:$0xf0] }
  0xb0   : > { %1166 = vmatpush.bf16.msrb.mxu2 %v1647_v50  ;;  %1179 = vmatpush.bf16.msrb.mxu3 %v1651_v51  ;;  %v1791_v50 = vor.u32 %v1924_v41, %v1790_v40  ;;  %v1795_v51 = vor.u32 %v1916_v44, %v1792_v45  ;;  %v1851_v23 = vld [vmem:[%s2281_s29 + $0xa4] sm:$0xf]  ;;  %v503_v24 = vld [vmem:[%s2281_s29 + $0x330] sm:$0x11]  ;;  %v1599_v25 = vor.u32 %v1876_v15, %v1598_v14  ;;  %v1534_v28 = vld [vmem:[%s2281_s29 + $0xa8] sm:$0xf] }
  0xb1   : > { %v1528_v27 = vld [vmem:[%s2281_s29 + $0xe0] sm:$0xf0]  ;;  %v1860_v30 = vld [vmem:[%s2281_s29 + $0xe4] sm:$0xf0]  ;;  %v1852_v31 = vld [vmem:[%s2281_s29 + $0xac] sm:$0xf]  ;;  %v820_v34 = vunpack.c.h.b16 %v503_v24 }
  0xb2   : > { %v1531_v36 = vor.u32 %v1851_v23, %v1528_v27  ;;  %v1462_v37 = vld [vmem:[%s2281_s29 + $0x20] sm:$0xf]  ;;  %v1535_v41 = vor.u32 %v1860_v30, %v1534_v28  ;;  %v1464_v44 = vld [vmem:[%s2281_s29 + $0x60] sm:$0xf0]  ;;  %v1470_v45 = vld [vmem:[%s2281_s29 + $0x28] sm:$0xf] }
  0xb3   : > { %1141 = vmatpush.bf16.msrb.mxu0 %v1575_v59  ;;  %1154 = vmatpush.bf16.msrb.mxu1 %v1579_v60  ;;  %v1723_v59 = vor.u32 %v1899_v52, %v1720_v53  ;;  %v1654_v60 = vld [vmem:[%s2281_s29 + $0x1a0] sm:$0xf]  ;;  %v1472_v48 = vld [vmem:[%s2281_s29 + $0x68] sm:$0xf0]  ;;  %v1798_v57 = vld [vmem:[%s2281_s29 + $0x2b0] sm:$0xf] }
  0xb4   : > { %1167 = vmatpush.bf16.msrb.mxu2 %v1583_v0  ;;  %1180 = vmatpush.bf16.msrb.mxu3 %v1587_v1  ;;  %v1883_v0 = vld [vmem:[%s2281_s29 + $0x1a4] sm:$0xf]  ;;  %v1655_v6 = vor.u32 %v1891_v61, %v1654_v60  ;;  %v1800_v60 = vld [vmem:[%s2281_s29 + $0x2f0] sm:$0xf0]  ;;  %v1918_v3 = vld [vmem:[%s2281_s29 + $0x2bc] sm:$0xf] }
  0xb5   : > { %v1656_v1 = vld [vmem:[%s2281_s29 + $0x1e0] sm:$0xf0]  ;;  %v1909_v8 = vld [vmem:[%s2281_s29 + $0x26c] sm:$0xf0]  ;;  %v1910_v14 = vld [vmem:[%s2281_s29 + $0x274] sm:$0xf0] }
  0xb6   : > { %v1659_v7 = vor.u32 %v1883_v0, %v1656_v1  ;;  %v1926_v0 = vld [vmem:[%s2281_s29 + $0x2f4] sm:$0xf0]  ;;  %v1902_v15 = vld [vmem:[%s2281_s29 + $0x23c] sm:$0xf] }
  0xb7   : > { %1142 = vmatpush.bf16.msrb.mxu0 %v1511_v11  ;;  %1155 = vmatpush.bf16.msrb.mxu1 %v1515_v12  ;;  %v1667_v11 = vor.u32 %v1884_v4, %v1664_v5  ;;  %v1867_v12 = vld [vmem:[%s2281_s29 + $0x124] sm:$0xf]  ;;  %v1808_v4 = vld [vmem:[%s2281_s29 + $0x2f8] sm:$0xf0]  ;;  %v1894_v27 = vld [vmem:[%s2281_s29 + $0x1f4] sm:$0xf0] }
  0xb8   : > { %1168 = vmatpush.bf16.msrb.mxu2 %v1519_v17  ;;  %1181 = vmatpush.bf16.msrb.mxu3 %v1523_v18  ;;  %v1600_v17 = vld [vmem:[%s2281_s29 + $0x168] sm:$0xf0]  ;;  %v1526_v18 = vld [vmem:[%s2281_s29 + $0xa0] sm:$0xf]  ;;  %v1595_v21 = vor.u32 %v1867_v12, %v1592_v13  ;;  %v1736_v12 = vld [vmem:[%s2281_s29 + $0x270] sm:$0xf0] }
  0xb9   : > { %v1527_v35 = vor.u32 %v1859_v22, %v1526_v18  ;;  %v1742_v13 = vld [vmem:[%s2281_s29 + $0x238] sm:$0xf]  ;;  %v1886_v28 = vld [vmem:[%s2281_s29 + $0x1bc] sm:$0xf] }
  0xba   : > { %v1743_v22 = vor.u32 %v1910_v14, %v1742_v13 }
  0xbb   : > { %1143 = vmatpush.bf16.msrb.mxu0 %v1447_v26  ;;  %1156 = vmatpush.bf16.msrb.mxu1 %v1451_v29  ;;  %v1603_v26 = vor.u32 %v1868_v16, %v1600_v17  ;;  %v504_v29 = vld [vmem:[%s2281_s29 + $0x338] sm:$0x11] }
  0xbc   : > { %1169 = vmatpush.bf16.msrb.mxu2 %v1455_v32  ;;  %1182 = vmatpush.bf16.msrb.mxu3 %v1459_v33  ;;  %v1536_v32 = vld [vmem:[%s2281_s29 + $0xe8] sm:$0xf0]  ;;  %v819_v33 = vunpack.c.l.b16 %v503_v24  ;;  %v822_v40 = vunpack.c.h.b16 %v504_v29  ;;  %v1744_v16 = vld [vmem:[%s2281_s29 + $0x278] sm:$0xf0]  ;;  %v1885_v24 = vld [vmem:[%s2281_s29 + $0x1b4] sm:$0xf] }
  0xbd   : > { %v1747_v23 = vor.u32 %v1902_v15, %v1744_v16 }
  0xbe   : > { %1817 = vmatmul.msk.bf16.vlgmr.msrb.gmra.mxu1 %vm1031_vm1, %v2354_v20  ;;  %1816 = vmatmul.msk.bf16.vlgmr.msrb.gmra.mxu0 %vm1031_vm1, %v2354_v20  ;;  %v934_v54 = vpack.c.b16 %v822_v40, %v822_v40  ;;  %v1870_v40 = vld [vmem:[%s2281_s29 + $0x13c] sm:$0xf] }
  0xbf   : > { %1189 = vmatpush.bf16.msra.mxu0 %v1061_v38  ;;  %1202 = vmatpush.bf16.msra.mxu1 %v1064_v39  ;;  %v1843_v38 = vld [vmem:[%s2281_s29 + $0x5c] sm:$0xf0]  ;;  %v821_v39 = vunpack.c.l.b16 %v504_v29  ;;  %v1680_v29 = vld [vmem:[%s2281_s29 + $0x1f8] sm:$0xf0] }
  0xc0   : > { %1215 = vmatpush.bf16.msra.mxu2 %v1067_v42  ;;  %1228 = vmatpush.bf16.msra.mxu3 %v1070_v43  ;;  %v1539_v42 = vor.u32 %v1852_v31, %v1536_v32  ;;  %v1835_v43 = vld [vmem:[%s2281_s29 + $0x24] sm:$0xf]  ;;  %v1463_v49 = vor.u32 %v1843_v38, %v1462_v37  ;;  %v1082_v2 = vsel %vm1035_vm0, %v934_v54, 0  ;;  %v1606_v32 = vld [vmem:[%s2281_s29 + $0x130] sm:$0xf] }
  0xc1   : > { %1819 = vmatmul.msk.bf16.vlgmr.msrb.gmra.mxu3 %vm1031_vm1, %v2354_v20  ;;  %1818 = vmatmul.msk.bf16.vlgmr.msrb.gmra.mxu2 %vm1031_vm1, %v2354_v20  ;;  %v1467_v52 = vor.u32 %v1835_v43, %v1464_v44  ;;  %v933_v53 = vpack.c.b16 %v821_v39, %v821_v39  ;;  %v1608_v37 = vld [vmem:[%s2281_s29 + $0x170] sm:$0xf0]  ;;  %v1614_v38 = vld [vmem:[%s2281_s29 + $0x138] sm:$0xf]  ;;  %v1542_v44 = vld [vmem:[%s2281_s29 + $0xb0] sm:$0xf] }
  0xc2   : > { %v1878_v39 = vld [vmem:[%s2281_s29 + $0x174] sm:$0xf0] }
  0xc3   : > { %1190 = vmatpush.bf16.msra.mxu0 %v1783_v46  ;;  %1203 = vmatpush.bf16.msra.mxu1 %v1787_v47  ;;  %v1844_v46 = vld [vmem:[%s2281_s29 + $0x64] sm:$0xf0]  ;;  %v1836_v47 = vld [vmem:[%s2281_s29 + $0x2c] sm:$0xf]  ;;  %v1079_v1 = vsel %vm1035_vm0, %v933_v53, 0 }
  0xc4   : > { %1216 = vmatpush.bf16.msra.mxu2 %v1791_v50  ;;  %1229 = vmatpush.bf16.msra.mxu3 %v1795_v51  ;;  %v931_v50 = vpack.c.b16 %v819_v33, %v819_v33  ;;  %v932_v51 = vpack.c.b16 %v820_v34, %v820_v34  ;;  %v1471_v55 = vor.u32 %v1844_v46, %v1470_v45  ;;  %v1877_v33 = vld [vmem:[%s2281_s29 + $0x16c] sm:$0xf0]  ;;  %v1552_v53 = vld [vmem:[%s2281_s29 + $0xf8] sm:$0xf0] }
  0xc5   : > { %v1475_v56 = vor.u32 %v1836_v47, %v1472_v48  ;;  %v1861_v45 = vld [vmem:[%s2281_s29 + $0xec] sm:$0xf0]  ;;  %v1615_v46 = vor.u32 %v1878_v39, %v1614_v38  ;;  %v1853_v48 = vld [vmem:[%s2281_s29 + $0xb4] sm:$0xf] }
  0xc6   : > { %v1073_v61 = vsel %vm1035_vm0, %v931_v50, 0  ;;  %v1550_v50 = vld [vmem:[%s2281_s29 + $0xb8] sm:$0xf]  ;;  %v1543_v54 = vor.u32 %v1861_v45, %v1542_v44 }
  0xc7   : > { %1191 = vmatpush.bf16.msra.mxu0 %v1719_v58  ;;  %1204 = vmatpush.bf16.msra.mxu1 %v1723_v59  ;;  %v1925_v58 = vld [vmem:[%s2281_s29 + $0x2ec] sm:$0xf0]  ;;  %v1917_v59 = vld [vmem:[%s2281_s29 + $0x2b4] sm:$0xf] }
  0xc8   : > { %1217 = vmatpush.bf16.msra.mxu2 %v1727_v62  ;;  %1230 = vmatpush.bf16.msra.mxu3 %v1731_v63  ;;  %v1076_v62 = vsel %vm1035_vm0, %v932_v51, 0  ;;  %v1806_v63 = vld [vmem:[%s2281_s29 + $0x2b8] sm:$0xf]  ;;  %v1799_v5 = vor.u32 %v1925_v58, %v1798_v57  ;;  %v1845_v57 = vld [vmem:[%s2281_s29 + $0x6c] sm:$0xf0] }
  0xc9   : > { %v1807_v9 = vor.u32 %v1926_v0, %v1806_v63  ;;  %v1862_v51 = vld [vmem:[%s2281_s29 + $0xf4] sm:$0xf0]  ;;  %v1838_v0 = vld [vmem:[%s2281_s29 + $0x3c] sm:$0xf] }
  0xca   : > { %v1551_v58 = vor.u32 %v1862_v51, %v1550_v50  ;;  %v1846_v63 = vld [vmem:[%s2281_s29 + $0x74] sm:$0xf0] }
  0xcb   : > { %1192 = vmatpush.bf16.msra.mxu0 %v1655_v6  ;;  %1205 = vmatpush.bf16.msra.mxu1 %v1659_v7  ;;  %v1803_v6 = vor.u32 %v1917_v59, %v1800_v60  ;;  %v1734_v7 = vld [vmem:[%s2281_s29 + $0x230] sm:$0xf]  ;;  %v1837_v60 = vld [vmem:[%s2281_s29 + $0x34] sm:$0xf] }
  0xcc   : > { %1218 = vmatpush.bf16.msra.mxu2 %v1663_v10  ;;  %1231 = vmatpush.bf16.msra.mxu3 %v1667_v11  ;;  %v1811_v10 = vor.u32 %v1918_v3, %v1808_v4  ;;  %v1901_v11 = vld [vmem:[%s2281_s29 + $0x234] sm:$0xf]  ;;  %v1735_v17 = vor.u32 %v1909_v8, %v1734_v7 }
  0xcd   : > { %v1739_v18 = vor.u32 %v1901_v11, %v1736_v12 }
  0xcf   : > { %1193 = vmatpush.bf16.msra.mxu0 %v1591_v19  ;;  %1206 = vmatpush.bf16.msra.mxu1 %v1595_v21  ;;  %v1670_v19 = vld [vmem:[%s2281_s29 + $0x1b0] sm:$0xf] }
  0xd0   : > { %1219 = vmatpush.bf16.msra.mxu2 %v1599_v25  ;;  %1232 = vmatpush.bf16.msra.mxu3 %v1603_v26  ;;  %v1893_v21 = vld [vmem:[%s2281_s29 + $0x1ec] sm:$0xf0]  ;;  %v1672_v25 = vld [vmem:[%s2281_s29 + $0x1f0] sm:$0xf0]  ;;  %v1678_v26 = vld [vmem:[%s2281_s29 + $0x1b8] sm:$0xf] }
  0xd1   : > { %v1671_v30 = vor.u32 %v1893_v21, %v1670_v19  ;;  %v1675_v31 = vor.u32 %v1885_v24, %v1672_v25  ;;  %v1679_v34 = vor.u32 %v1894_v27, %v1678_v26 }
  0xd3   : > { %1194 = vmatpush.bf16.msra.mxu0 %v1527_v35  ;;  %1207 = vmatpush.bf16.msra.mxu1 %v1531_v36  ;;  %v1683_v35 = vor.u32 %v1886_v28, %v1680_v29  ;;  %v1869_v36 = vld [vmem:[%s2281_s29 + $0x134] sm:$0xf] }
  0xd4   : > { %1220 = vmatpush.bf16.msra.mxu2 %v1535_v41  ;;  %1233 = vmatpush.bf16.msra.mxu3 %v1539_v42  ;;  %v1616_v41 = vld [vmem:[%s2281_s29 + $0x178] sm:$0xf0]  ;;  %v1607_v42 = vor.u32 %v1877_v33, %v1606_v32  ;;  %v1611_v43 = vor.u32 %v1869_v36, %v1608_v37 }
  0xd5   : > { %v1619_v47 = vor.u32 %v1870_v40, %v1616_v41 }
  0xd7   : > { %1195 = vmatpush.bf16.msra.mxu0 %v1463_v49  ;;  %1208 = vmatpush.bf16.msra.mxu1 %v1467_v52  ;;  %v1544_v49 = vld [vmem:[%s2281_s29 + $0xf0] sm:$0xf0]  ;;  %v1854_v52 = vld [vmem:[%s2281_s29 + $0xbc] sm:$0xf] }
  0xd8   : > { %1221 = vmatpush.bf16.msra.mxu2 %v1471_v55  ;;  %1234 = vmatpush.bf16.msra.mxu3 %v1475_v56  ;;  %v1547_v55 = vor.u32 %v1853_v48, %v1544_v49  ;;  %v1478_v56 = vld [vmem:[%s2281_s29 + $0x30] sm:$0xf]  ;;  %v1555_v59 = vor.u32 %v1854_v52, %v1552_v53 }
  0xda   : > { %1821 = vmatmul.msk.bf16.vlgmr.msra.gmra.mxu1 %vm1031_vm1, %v2354_v20  ;;  %1820 = vmatmul.msk.bf16.vlgmr.msra.gmra.mxu0 %vm1031_vm1, %v2354_v20 }
  0xdb   : > { %1241 = vmatpush.bf16.msrb.mxu0 %v1073_v61  ;;  %1254 = vmatpush.bf16.msrb.mxu1 %v1076_v62  ;;  %v1480_v61 = vld [vmem:[%s2281_s29 + $0x70] sm:$0xf0]  ;;  %v1486_v62 = vld [vmem:[%s2281_s29 + $0x38] sm:$0xf] }
  0xdc   : > { %1267 = vmatpush.bf16.msrb.mxu2 %v1079_v1  ;;  %1280 = vmatpush.bf16.msrb.mxu3 %v1082_v2  ;;  %v1488_v1 = vld [vmem:[%s2281_s29 + $0x78] sm:$0xf0]  ;;  %v1479_v2 = vor.u32 %v1845_v57, %v1478_v56  ;;  %v1483_v3 = vor.u32 %v1837_v60, %v1480_v61  ;;  %v1487_v4 = vor.u32 %v1846_v63, %v1486_v62 }
  0xdd   : > { %1823 = vmatmul.msk.bf16.vlgmr.msra.gmra.mxu3 %vm1031_vm1, %v2354_v20  ;;  %1822 = vmatmul.msk.bf16.vlgmr.msra.gmra.mxu2 %vm1031_vm1, %v2354_v20 }
  0xdf   : > { %1242 = vmatpush.bf16.msrb.mxu0 %v1799_v5  ;;  %1255 = vmatpush.bf16.msrb.mxu1 %v1803_v6  ;;  %v1491_v5 = vor.u32 %v1838_v0, %v1488_v1 }
  0xe0   : > { %1268 = vmatpush.bf16.msrb.mxu2 %v1807_v9  ;;  %1281 = vmatpush.bf16.msrb.mxu3 %v1811_v10 }
  0xe3   : > { %1243 = vmatpush.bf16.msrb.mxu0 %v1735_v17  ;;  %1256 = vmatpush.bf16.msrb.mxu1 %v1739_v18 }
  0xe4   : > { %1269 = vmatpush.bf16.msrb.mxu2 %v1743_v22  ;;  %1282 = vmatpush.bf16.msrb.mxu3 %v1747_v23 }
  0xe7   : > { %1244 = vmatpush.bf16.msrb.mxu0 %v1671_v30  ;;  %1257 = vmatpush.bf16.msrb.mxu1 %v1675_v31 }
  0xe8   : > { %1270 = vmatpush.bf16.msrb.mxu2 %v1679_v34  ;;  %1283 = vmatpush.bf16.msrb.mxu3 %v1683_v35 }
  0xeb   : > { %1245 = vmatpush.bf16.msrb.mxu0 %v1607_v42  ;;  %1258 = vmatpush.bf16.msrb.mxu1 %v1611_v43 }
  0xec   : > { %1271 = vmatpush.bf16.msrb.mxu2 %v1615_v46  ;;  %1284 = vmatpush.bf16.msrb.mxu3 %v1619_v47 }
  0xef   : > { %1246 = vmatpush.bf16.msrb.mxu0 %v1543_v54  ;;  %1259 = vmatpush.bf16.msrb.mxu1 %v1547_v55 }
  0xf0   : > { %1272 = vmatpush.bf16.msrb.mxu2 %v1551_v58  ;;  %1285 = vmatpush.bf16.msrb.mxu3 %v1555_v59 }
  0xf3   : > { %1247 = vmatpush.bf16.msrb.mxu0 %v1479_v2  ;;  %1260 = vmatpush.bf16.msrb.mxu1 %v1483_v3 }
  0xf4   : > { %1273 = vmatpush.bf16.msrb.mxu2 %v1487_v4  ;;  %1286 = vmatpush.bf16.msrb.mxu3 %v1491_v5 }
  0xf6   : > { %1824 = vmatmul.msk.bf16.vlgmr.msrb.gmra.mxu0 %vm1031_vm1, %v2354_v20  ;;  %1825 = vmatmul.msk.bf16.vlgmr.msrb.gmra.mxu1 %vm1031_vm1, %v2354_v20 }
  0xf7   : > { %1826 = vmatmul.msk.bf16.vlgmr.msrb.gmra.mxu2 %vm1031_vm1, %v2354_v20  ;;  %1827 = vmatmul.msk.bf16.vlgmr.msrb.gmra.mxu3 %vm1031_vm1, %v2354_v20 }
 0x118   : > { %v2541_v8 = vpop.permute.xlu0 %508 }
 0x11f   : > { %v1106_v6 = vpop.f32.mrf.mxu1  ;;  %v1093_v7 = vpop.f32.mrf.mxu0 }
 0x120   : > { %v1094_v11 = vadd.f32 %v1093_v7, %v2541_v8  ;;  %v1107_v12 = vadd.f32 %v1106_v6, %v2541_v8 }
 0x122   : > { %1955 = vtanh.f32 %v1094_v11 }
 0x127   : > { %v1108_v20 = vpop.f32.mrf.mxu1  ;;  %v1095_v15 = vpop.f32.mrf.mxu0 }
 0x128   : > { %v1132_v9 = vpop.f32.mrf.mxu3  ;;  %v1119_v10 = vpop.f32.mrf.mxu2 }
 0x129   : > { %v1120_v13 = vadd.f32 %v1119_v10, %v2541_v8  ;;  %v1133_v14 = vadd.f32 %v1132_v9, %v2541_v8  ;;  %v1956_v16 = vpop.eup %1955 }
 0x12b   : > { %1957 = vtanh.f32 %v1120_v13 }
 0x12c   : > { %1959 = vtanh.f32 %v1107_v12 }
 0x12d   : > { %1961 = vtanh.f32 %v1133_v14 }
 0x130   : > { %v1134_v17 = vpop.f32.mrf.mxu3  ;;  %v1121_v18 = vpop.f32.mrf.mxu2 }
 0x131   : > { %v1958_v19 = vpop.eup %1957 }
 0x132   : > { %v1960_v21 = vpop.eup %1959 }
 0x133   : > { %v1962_v22 = vpop.eup %1961  ;;  %v1324_v23 = vrot.slane %v1960_v21, 4 }
 0x134   : > { %v1325_v24 = vrot.slane %v1962_v22, 4 }
 0x135   : > { %v1333_v25 = vsel %vm1332_vm2, %v1956_v16, %v1324_v23 }
 0x136   : > { %v1334_v26 = vsel %vm1332_vm2, %v1958_v19, %v1325_v24  ;;  %1349 = vst [vmem:[%s2550_s11] sm:$0x77] %v1333_v25 }
 0x137   : > { %1350 = vst [vmem:[%s2550_s11 + $0x8] sm:$0x77] %v1334_v26 }
 0x13b   : > { %v1158_v27 = vpop.f32.mrf.mxu1  ;;  %v1145_v28 = vpop.f32.mrf.mxu0 }
 0x13c   : > { %v1159_v29 = vadd.f32 %v1158_v27, %v2541_v8  ;;  %v1146_v30 = vadd.f32 %v1145_v28, %v2541_v8 }
 0x13e   : > { %1963 = vtanh.f32 %v1159_v29 }
 0x13f   : > { %1965 = vtanh.f32 %v1146_v30 }
 0x143   : > { %v1160_v35 = vpop.f32.mrf.mxu1  ;;  %v1147_v36 = vpop.f32.mrf.mxu0 }
 0x144   : > { %v1184_v31 = vpop.f32.mrf.mxu3  ;;  %v1171_v32 = vpop.f32.mrf.mxu2 }
 0x145   : > { %v1185_v33 = vadd.f32 %v1184_v31, %v2541_v8  ;;  %v1172_v34 = vadd.f32 %v1171_v32, %v2541_v8  ;;  %v1964_v37 = vpop.eup %1963 }
 0x146   : > { %v1966_v38 = vpop.eup %1965  ;;  %v1326_v39 = vrot.slane %v1964_v37, 4 }
 0x147   : > { %1967 = vtanh.f32 %v1185_v33 }
 0x148   : > { %1969 = vtanh.f32 %v1172_v34  ;;  %v1335_v40 = vsel %vm1332_vm2, %v1966_v38, %v1326_v39 }
 0x149   : > { %1351 = vst [vmem:[%s2550_s11 + $0x10] sm:$0x77] %v1335_v40 }
 0x14c   : > { %v1186_v41 = vpop.f32.mrf.mxu3  ;;  %v1173_v42 = vpop.f32.mrf.mxu2 }
 0x14d   : > { %v1968_v43 = vpop.eup %1967 }
 0x14e   : > { %v1970_v44 = vpop.eup %1969  ;;  %v1327_v45 = vrot.slane %v1968_v43, 4 }
 0x150   : > { %v1336_v46 = vsel %vm1332_vm2, %v1970_v44, %v1327_v45 }
 0x151   : > { %1352 = vst [vmem:[%s2550_s11 + $0x18] sm:$0x77] %v1336_v46 }
 0x157   : > { %v1210_v47 = vpop.f32.mrf.mxu1  ;;  %v1197_v48 = vpop.f32.mrf.mxu0 }
 0x158   : > { %v1211_v49 = vadd.f32 %v1210_v47, %v2541_v8  ;;  %v1198_v50 = vadd.f32 %v1197_v48, %v2541_v8 }
 0x15a   : > { %1971 = vtanh.f32 %v1211_v49 }
 0x15b   : > { %1973 = vtanh.f32 %v1198_v50 }
 0x15f   : > { %v1212_v55 = vpop.f32.mrf.mxu1  ;;  %v1199_v56 = vpop.f32.mrf.mxu0 }
 0x160   : > { %v1236_v51 = vpop.f32.mrf.mxu3  ;;  %v1223_v52 = vpop.f32.mrf.mxu2 }
 0x161   : > { %v1237_v53 = vadd.f32 %v1236_v51, %v2541_v8  ;;  %v1224_v54 = vadd.f32 %v1223_v52, %v2541_v8  ;;  %v1972_v57 = vpop.eup %1971 }
 0x162   : > { %v1974_v58 = vpop.eup %1973  ;;  %v1328_v59 = vrot.slane %v1972_v57, 4 }
 0x163   : > { %1975 = vtanh.f32 %v1237_v53 }
 0x164   : > { %1977 = vtanh.f32 %v1224_v54  ;;  %v1337_v60 = vsel %vm1332_vm2, %v1974_v58, %v1328_v59 }
 0x165   : > { %1353 = vst [vmem:[%s2550_s11 + $0x20] sm:$0x77] %v1337_v60 }
 0x168   : > { %v1238_v61 = vpop.f32.mrf.mxu3  ;;  %v1225_v62 = vpop.f32.mrf.mxu2 }
 0x169   : > { %v1976_v63 = vpop.eup %1975 }
 0x16a   : > { %v1978_v0 = vpop.eup %1977  ;;  %v1329_v1 = vrot.slane %v1976_v63, 4 }
 0x16c   : > { %v1338_v2 = vsel %vm1332_vm2, %v1978_v0, %v1329_v1 }
 0x16d   : > { %1354 = vst [vmem:[%s2550_s11 + $0x28] sm:$0x77] %v1338_v2 }
 0x173   : > { %v1249_v3 = vpop.f32.mrf.mxu0  ;;  %v1262_v4 = vpop.f32.mrf.mxu1 }
 0x174   : > { %v1250_v5 = vadd.f32 %v1249_v3, %v2541_v8  ;;  %v1263_v6 = vadd.f32 %v1262_v4, %v2541_v8 }
 0x176   : > { %1979 = vtanh.f32 %v1250_v5 }
 0x177   : > { %1981 = vtanh.f32 %v1263_v6 }
 0x17a   : > { %v1275_v7 = vpop.f32.mrf.mxu2  ;;  %v1288_v9 = vpop.f32.mrf.mxu3 }
 0x17b   : > { %v1289_v10 = vadd.f32 %v1288_v9, %v2541_v8  ;;  %v1251_v11 = vpop.f32.mrf.mxu0  ;;  %v1264_v12 = vpop.f32.mrf.mxu1  ;;  %v1276_v14 = vadd.f32 %v1275_v7, %v2541_v8 }
 0x17c   : > { %v1980_v13 = vpop.eup %1979 }
 0x17d   : > { %v1982_v20 = vpop.eup %1981  ;;  %1983 = vtanh.f32 %v1289_v10 }
 0x17e   : > { %v1330_v15 = vrot.slane %v1982_v20, 4  ;;  %1985 = vtanh.f32 %v1276_v14 }
 0x180   : > { %v1339_v16 = vsel %vm1332_vm2, %v1980_v13, %v1330_v15 }
 0x181   : > { %1355 = vst [vmem:[%s2550_s11 + $0x30] sm:$0x77] %v1339_v16 }
 0x182   : > { %v1277_v17 = vpop.f32.mrf.mxu2  ;;  %v1290_v18 = vpop.f32.mrf.mxu3 }
 0x183   : > { %v1984_v19 = vpop.eup %1983 }
 0x184   : > { %v1331_v21 = vrot.slane %v1984_v19, 4  ;;  %v1986_v22 = vpop.eup %1985 }
 0x186   : > { %v1340_v23 = vsel %vm1332_vm2, %v1986_v22, %v1331_v21 }
 0x187   : > { %1356 = vst [vmem:[%s2550_s11 + $0x38] sm:$0x77] %v1340_v23 }
 0x188 PF: > { %p10_p9 = scmp.ge.s32.totalorder %s2049_s16, 6   ;;  %s2594_s12 = smov %s2005_s13 }
 0x189   : > { %s2595_s13 = smov %s2058_s19  ;;  %s2596_s14 = smov %s2049_s16 }
 0x18a   :  { %12 = sbr.rel (!%p10_p9) target bundleno = 2 (0x2), region = 90 }

</bundles_post_ra>
